<compile_context>
chip_gen: v5e
topology: v5e:2x2
jax: 0.10.0
libtpu: 0.0.40
codegen_flags: <defaults>
</compile_context>

<pallas_src>
import numpy as np
import jax
import jax.numpy as jnp
from jax import lax
from jax.experimental import pallas as pl
from jax.experimental.pallas import tpu as pltpu

EPS = 1e-5
NEG_SLOPE = 0.01          # F.leaky_relu default
NUM_STAGES = 2            # args.num_stages
CNN_FILTERS = 8           # args.cnn_num_filters
CONV_PADDING = 1          # args.conv_padding
KSIZE = 3
NUM_CLASSES = 5
OUT_LANES = 128           # lane-dense kernel output width (sliced in wrapper)


def _idiv(q, d):
    if d & (d - 1) == 0:
        return q >> (d.bit_length() - 1)
    return q // d


def _imod(q, d):
    if d & (d - 1) == 0:
        return q & (d - 1)
    return q % d


# ----------------------------------------------------------------------------
# Fused kernel
# ----------------------------------------------------------------------------
def _make_fused_kernel(B, H, W):
    H1, W1 = H // 2, W // 2          # spatial dims after pool 1
    N0 = B * H * W                   # stage-0 flat lanes (b, h, w)
    N1 = B * H1 * W1                 # stage-1 flat lanes (b, h1, w1)

    def conv_bn_lrelu(x, w_flat, gamma, beta, h, w):
        """3x3 conv (pad 1, stride 1) + training-mode BN + leaky relu.

        x: (C_in, n) activation, lanes in flat (b, h, w) order.
        w_flat: (C_out, 9*C_in), tap-major (kh*3+kw) then input channel.
        Conv bias folds away exactly: BN subtracts the per-channel batch mean,
        which cancels any constant per-channel offset.
        """
        n = x.shape[1]
        q = lax.broadcasted_iota(jnp.int32, (1, n), 1)
        row = _imod(_idiv(q, w), h)
        col = _imod(q, w)
        # 4 validity vectors per stage; per tap at most one AND, center tap free.
        vmask = {-1: row >= 1, 0: None, 1: row <= h - 2}
        hmask = {-1: col >= 1, 0: None, 1: col <= w - 2}

        pieces = []
        for dh in (-1, 0, 1):
            for dw in (-1, 0, 1):
                off = dh * w + dw
                xs = x if off == 0 else pltpu.roll(x, (-off) % n, axis=1)
                vm, hm = vmask[dh], hmask[dw]
                m = vm if hm is None else (hm if vm is None else vm & hm)
                pieces.append(xs if m is None else jnp.where(m, xs, 0.0))
        slab = jnp.concatenate(pieces, axis=0)            # (9*C_in, n)
        # One MXU matmul per stage (accumulation stays inside the MXU).
        y = jnp.dot(w_flat, slab, preferred_element_type=jnp.float32)

        # Batch norm over the lane axis (= batch x spatial); two-pass stats.
        # TODO(synk): running_mean/var momentum updates are training-time
        # buffer side effects only; they do not affect the forward output.
        inv_n = 1.0 / n
        mean = jnp.sum(y, axis=1, keepdims=True) * inv_n
        cen = y - mean
        var = jnp.sum(cen * cen, axis=1, keepdims=True) * inv_n
        z = cen * (lax.rsqrt(var + EPS) * gamma) + beta
        return jnp.where(z > 0, z, NEG_SLOPE * z)

    def window_max(z, w_row, n):
        """2x2 window max; valid at even-(h,w) anchor lanes (others ignored)."""
        m = jnp.maximum(z, pltpu.roll(z, n - 1, axis=1))        # right neighbour
        return jnp.maximum(m, pltpu.roll(m, n - w_row, axis=1))  # row below

    def kernel(x_ref, w1_ref, g1_ref, b1_ref, w2_ref, g2_ref, b2_ref,
               wexp_ref, gpad_ref, bias_ref, o_ref):
        # ---- stage 0: conv + BN + leaky relu + 2x2 max pool -----------------
        z1 = conv_bn_lrelu(x_ref[...], w1_ref[...], g1_ref[...], b1_ref[...],
                           H, W)
        m1 = window_max(z1, W, N0)
        # Anchor compaction matrix generated in-kernel (no HBM traffic).
        r = lax.broadcasted_iota(jnp.int32, (1, N1), 1)
        bidx = _idiv(r, H1 * W1)
        i = _imod(_idiv(r, W1), H1)
        j = _imod(r, W1)
        anchor = bidx * (H * W) + (2 * i) * W + 2 * j           # (1, N1)
        qcol = lax.broadcasted_iota(jnp.int32, (N0, 1), 0)
        sel1 = jnp.where(qcol == anchor, 1.0, 0.0)              # (N0, N1)
        p1 = jnp.dot(m1, sel1, preferred_element_type=jnp.float32)  # (C, N1)

        # ---- stage 1: conv + BN + leaky relu + 2x2 window max ---------------
        z2 = conv_bn_lrelu(p1, w2_ref[...], g2_ref[...], b2_ref[...], H1, W1)
        m2 = window_max(z2, W1, N1)                             # (C, N1)

        # ---- fused pool-2 compaction + NCHW flatten + linear ----------------
        # wexp[k*C + c, q] = LW[k, c*hw2 + pooled_pos(q)] at anchor lanes, 0
        # elsewhere (tiled over batch); channel-group sum via gpad, per-batch
        # segment sum via an iota-generated block indicator.
        c_out = m2.shape[0]
        reps = wexp_ref.shape[0] // c_out
        prod = jnp.concatenate([m2] * reps, axis=0) * wexp_ref[...]   # (K*C, N1)
        t = jnp.dot(gpad_ref[...], prod,
                    preferred_element_type=jnp.float32)               # (k_pad, N1)
        qq = lax.broadcasted_iota(jnp.int32, (N1, OUT_LANES), 0)
        bb = lax.broadcasted_iota(jnp.int32, (N1, OUT_LANES), 1)
        ind = jnp.where(_idiv(qq, H1 * W1) == bb, 1.0, 0.0)            # (N1, 128)
        # logits^T, lane-dense padded to 128 batch slots.
        o_ref[...] = (jnp.dot(t, ind, preferred_element_type=jnp.float32)
                      + bias_ref[...])

    return kernel


# ----------------------------------------------------------------------------
# Wrapper
# ----------------------------------------------------------------------------
@jax.jit
def vgg_forward(x_nchw, params):
    """Fused single-pallas_call forward of VGGReLUNormNetwork (max_pooling)."""
    B, C_in, H, W = x_nchw.shape
    assert NUM_STAGES == 2 and H % 4 == 0 and W % 4 == 0 and B <= OUT_LANES
    H1, W1 = H // 2, W // 2
    H2, W2 = H1 // 2, W1 // 2
    C = CNN_FILTERS

    # Lane-dense layout: channels on sublanes, flat (b, h, w) pixels on lanes.
    x_flat = jnp.transpose(x_nchw, (1, 0, 2, 3)).reshape(C_in, B * H * W)

    def conv_operands(i):
        w, _bias, gamma, beta = params[f"conv{i}"]   # conv bias folds into BN
        cout, cin = w.shape[0], w.shape[1]
        w_flat = jnp.transpose(w, (0, 2, 3, 1)).reshape(cout, KSIZE * KSIZE * cin)
        return w_flat, gamma.reshape(cout, 1), beta.reshape(cout, 1)

    w1, g1, b1 = conv_operands(0)
    w2, g2, b2 = conv_operands(1)

    lw, lb = params["linear"]                         # (K, C*H2*W2), (K,)
    K = lw.shape[0]
    assert lw.shape[1] == C * H2 * W2
    k_pad = max(8, -(-K // 8) * 8)

    # Expand the linear weight onto stage-2 pre-pool anchor lanes (per image)
    # and tile over batch: fuses pool-2 compaction + NCHW flatten + linear.
    lw_r = lw.reshape(K, C, H2, W2)
    wexp = jnp.zeros((K, C, H1, W1), lw.dtype).at[:, :, ::2, ::2].set(lw_r)
    wexp = jnp.tile(wexp.reshape(K * C, H1 * W1), (1, B))        # (K*C, B*H1*W1)

    gpad_np = np.zeros((k_pad, K * C), np.float32)               # channel-group sum
    for k in range(K):
        gpad_np[k, k * C:(k + 1) * C] = 1.0
    gpad = jnp.asarray(gpad_np)

    bias_col = jnp.zeros((k_pad, 1), jnp.float32).at[:K, 0].set(lb)

    kernel = _make_fused_kernel(B, H, W)
    vspec = pl.BlockSpec(memory_space=pltpu.MemorySpace.VMEM)
    out_pad = pl.pallas_call(
        kernel,
        out_shape=jax.ShapeDtypeStruct((k_pad, OUT_LANES), jnp.float32),
        in_specs=[vspec] * 10,
        out_specs=vspec,
    )(x_flat, w1, g1, b1, w2, g2, b2, wexp, gpad, bias_col)

    # Kernel emits lane-dense logits^T padded to (k_pad, 128); slice + transpose.
    return out_pad[:K, :B].T


# ----------------------------------------------------------------------------
# Deterministic parameter construction (mirrors the module's __init__)
# ----------------------------------------------------------------------------
def xavier_uniform(key, shape, fan_in, fan_out):
    bound = (6.0 / (fan_in + fan_out)) ** 0.5
    return jax.random.uniform(key, shape, jnp.float32, -bound, bound)


def build_params(key, in_channels):
    params = {}
    c = in_channels
    for i in range(NUM_STAGES):
        key, wk = jax.random.split(key)
        w = xavier_uniform(wk, (CNN_FILTERS, c, KSIZE, KSIZE),
                           fan_in=c * KSIZE * KSIZE,
                           fan_out=CNN_FILTERS * KSIZE * KSIZE)
        b = jnp.zeros((CNN_FILTERS,), jnp.float32)      # conv bias (cancels in BN)
        gamma = jnp.ones((CNN_FILTERS,), jnp.float32)   # BN weight
        beta = jnp.zeros((CNN_FILTERS,), jnp.float32)   # BN bias
        params[f"conv{i}"] = (w, b, gamma, beta)
        c = CNN_FILTERS
    return params, key


# ----------------------------------------------------------------------------
# Pure-JAX reference for validation
# ----------------------------------------------------------------------------
def reference_forward(x, params):
    out = x
    for i in range(NUM_STAGES):
        w, b, g, bt = params[f"conv{i}"]
        out = lax.conv_general_dilated(
            out, w, window_strides=(1, 1),
            padding=[(CONV_PADDING, CONV_PADDING)] * 2,
            dimension_numbers=("NCHW", "OIHW", "NCHW"))
        out = out + b[None, :, None, None]
        mean = out.mean(axis=(0, 2, 3), keepdims=True)
        var = out.var(axis=(0, 2, 3), keepdims=True)
        out = (out - mean) / jnp.sqrt(var + EPS)
        out = out * g[None, :, None, None] + bt[None, :, None, None]
        out = jnp.where(out > 0, out, NEG_SLOPE * out)
        B, C, H, W = out.shape
        out = out.reshape(B, C, H // 2, 2, W // 2, 2).max(axis=(3, 5))
    out = out.reshape(out.shape[0], -1)
    lw, lb = params["linear"]
    return out @ lw.T + lb


# ----------------------------------------------------------------------------
if __name__ == "__main__":
    key = jax.random.PRNGKey(0)

    B, C, H, W = 2, 4, 16, 16          # im_shape
    key, xk = jax.random.split(key)
    x = jax.random.normal(xk, (B, C, H, W), jnp.float32)

    params, key = build_params(key, C)

    # Final linear layer: flattened features = CNN_FILTERS * (H/4) * (W/4)
    feat = CNN_FILTERS * (H // (2 ** NUM_STAGES)) * (W // (2 ** NUM_STAGES))
    key, lk = jax.random.split(key)
    lw = xavier_uniform(lk, (NUM_CLASSES, feat), fan_in=feat, fan_out=NUM_CLASSES)
    lb = jnp.zeros((NUM_CLASSES,), jnp.float32)
    params["linear"] = (lw, lb)

    out = jax.block_until_ready(vgg_forward(x, params))
    ref = reference_forward(x, params)

    assert out.shape == (B, NUM_CLASSES), out.shape
    max_err = float(jnp.max(jnp.abs(out - ref)))
    assert jnp.allclose(out, ref, rtol=2e-4, atol=2e-4), ("mismatch", max_err)

    print("KERNEL_OK")
</pallas_src>

<mosaic_0001>
module attributes {stable_mosaic.version = 11 : i64} {
  func.func @kernel(%arg0: memref<4x512xf32, #tpu.memory_space<vmem>>, %arg1: memref<8x36xf32, #tpu.memory_space<vmem>>, %arg2: memref<8x1xf32, #tpu.memory_space<vmem>>, %arg3: memref<8x1xf32, #tpu.memory_space<vmem>>, %arg4: memref<8x72xf32, #tpu.memory_space<vmem>>, %arg5: memref<8x1xf32, #tpu.memory_space<vmem>>, %arg6: memref<8x1xf32, #tpu.memory_space<vmem>>, %arg7: memref<40x128xf32, #tpu.memory_space<vmem>>, %arg8: memref<8x40xf32, #tpu.memory_space<vmem>>, %arg9: memref<8x1xf32, #tpu.memory_space<vmem>>, %arg10: memref<8x128xf32, #tpu.memory_space<vmem>>) attributes {dimension_semantics = [], scalar_prefetch = 0 : i64, scratch_operands = 0 : i64, tpu.core_type = #tpu.core_type<tc>} {
    %c0 = arith.constant 0 : index
    %c0_0 = arith.constant 0 : index
    %0 = vector.load %arg0[%c0, %c0_0] : memref<4x512xf32, #tpu.memory_space<vmem>>, vector<4x512xf32>
    %c0_1 = arith.constant 0 : index
    %c0_2 = arith.constant 0 : index
    %1 = vector.load %arg1[%c0_1, %c0_2] : memref<8x36xf32, #tpu.memory_space<vmem>>, vector<8x36xf32>
    %c0_3 = arith.constant 0 : index
    %c0_4 = arith.constant 0 : index
    %2 = vector.load %arg2[%c0_3, %c0_4] : memref<8x1xf32, #tpu.memory_space<vmem>>, vector<8x1xf32>
    %c0_5 = arith.constant 0 : index
    %c0_6 = arith.constant 0 : index
    %3 = vector.load %arg3[%c0_5, %c0_6] : memref<8x1xf32, #tpu.memory_space<vmem>>, vector<8x1xf32>
    %4 = tpu.iota {dimensions = array<i32: 1>} : vector<1x512xi32>
    %c4_i32 = arith.constant 4 : i32
    %5 = vector.broadcast %c4_i32 : i32 to vector<1x512xi32>
    %6 = arith.shrsi %4, %5 : vector<1x512xi32>
    %c15_i32 = arith.constant 15 : i32
    %7 = vector.broadcast %c15_i32 : i32 to vector<1x512xi32>
    %8 = arith.andi %6, %7 : vector<1x512xi32>
    %c15_i32_7 = arith.constant 15 : i32
    %9 = vector.broadcast %c15_i32_7 : i32 to vector<1x512xi32>
    %10 = arith.andi %4, %9 : vector<1x512xi32>
    %c1_i32 = arith.constant 1 : i32
    %11 = vector.broadcast %c1_i32 : i32 to vector<1x512xi32>
    %12 = arith.cmpi sge, %8, %11 : vector<1x512xi32>
    %c14_i32 = arith.constant 14 : i32
    %13 = vector.broadcast %c14_i32 : i32 to vector<1x512xi32>
    %14 = arith.cmpi sle, %8, %13 : vector<1x512xi32>
    %c1_i32_8 = arith.constant 1 : i32
    %15 = vector.broadcast %c1_i32_8 : i32 to vector<1x512xi32>
    %16 = arith.cmpi sge, %10, %15 : vector<1x512xi32>
    %c14_i32_9 = arith.constant 14 : i32
    %17 = vector.broadcast %c14_i32_9 : i32 to vector<1x512xi32>
    %18 = arith.cmpi sle, %10, %17 : vector<1x512xi32>
    %c17_i32 = arith.constant 17 : i32
    %19 = tpu.dynamic_rotate %0 by %c17_i32 dim 1 : vector<4x512xf32>, i32 -> vector<4x512xf32>
    %20 = arith.andi %12, %16 : vector<1x512xi1>
    %cst = arith.constant 0.000000e+00 : f32
    %21 = vector.shape_cast %20 : vector<1x512xi1> to vector<1x512xi1>
    %22 = vector.broadcast %21 : vector<1x512xi1> to vector<4x512xi1>
    %23 = vector.broadcast %cst : f32 to vector<4x512xf32>
    %24 = arith.select %22, %19, %23 : vector<4x512xi1>, vector<4x512xf32>
    %c16_i32 = arith.constant 16 : i32
    %25 = tpu.dynamic_rotate %0 by %c16_i32 dim 1 : vector<4x512xf32>, i32 -> vector<4x512xf32>
    %cst_10 = arith.constant 0.000000e+00 : f32
    %26 = vector.shape_cast %12 : vector<1x512xi1> to vector<1x512xi1>
    %27 = vector.broadcast %26 : vector<1x512xi1> to vector<4x512xi1>
    %28 = vector.broadcast %cst_10 : f32 to vector<4x512xf32>
    %29 = arith.select %27, %25, %28 : vector<4x512xi1>, vector<4x512xf32>
    %c15_i32_11 = arith.constant 15 : i32
    %30 = tpu.dynamic_rotate %0 by %c15_i32_11 dim 1 : vector<4x512xf32>, i32 -> vector<4x512xf32>
    %31 = arith.andi %12, %18 : vector<1x512xi1>
    %cst_12 = arith.constant 0.000000e+00 : f32
    %32 = vector.shape_cast %31 : vector<1x512xi1> to vector<1x512xi1>
    %33 = vector.broadcast %32 : vector<1x512xi1> to vector<4x512xi1>
    %34 = vector.broadcast %cst_12 : f32 to vector<4x512xf32>
    %35 = arith.select %33, %30, %34 : vector<4x512xi1>, vector<4x512xf32>
    %c1_i32_13 = arith.constant 1 : i32
    %36 = tpu.dynamic_rotate %0 by %c1_i32_13 dim 1 : vector<4x512xf32>, i32 -> vector<4x512xf32>
    %cst_14 = arith.constant 0.000000e+00 : f32
    %37 = vector.shape_cast %16 : vector<1x512xi1> to vector<1x512xi1>
    %38 = vector.broadcast %37 : vector<1x512xi1> to vector<4x512xi1>
    %39 = vector.broadcast %cst_14 : f32 to vector<4x512xf32>
    %40 = arith.select %38, %36, %39 : vector<4x512xi1>, vector<4x512xf32>
    %c511_i32 = arith.constant 511 : i32
    %41 = tpu.dynamic_rotate %0 by %c511_i32 dim 1 : vector<4x512xf32>, i32 -> vector<4x512xf32>
    %cst_15 = arith.constant 0.000000e+00 : f32
    %42 = vector.shape_cast %18 : vector<1x512xi1> to vector<1x512xi1>
    %43 = vector.broadcast %42 : vector<1x512xi1> to vector<4x512xi1>
    %44 = vector.broadcast %cst_15 : f32 to vector<4x512xf32>
    %45 = arith.select %43, %41, %44 : vector<4x512xi1>, vector<4x512xf32>
    %c497_i32 = arith.constant 497 : i32
    %46 = tpu.dynamic_rotate %0 by %c497_i32 dim 1 : vector<4x512xf32>, i32 -> vector<4x512xf32>
    %47 = arith.andi %14, %16 : vector<1x512xi1>
    %cst_16 = arith.constant 0.000000e+00 : f32
    %48 = vector.shape_cast %47 : vector<1x512xi1> to vector<1x512xi1>
    %49 = vector.broadcast %48 : vector<1x512xi1> to vector<4x512xi1>
    %50 = vector.broadcast %cst_16 : f32 to vector<4x512xf32>
    %51 = arith.select %49, %46, %50 : vector<4x512xi1>, vector<4x512xf32>
    %c496_i32 = arith.constant 496 : i32
    %52 = tpu.dynamic_rotate %0 by %c496_i32 dim 1 : vector<4x512xf32>, i32 -> vector<4x512xf32>
    %cst_17 = arith.constant 0.000000e+00 : f32
    %53 = vector.shape_cast %14 : vector<1x512xi1> to vector<1x512xi1>
    %54 = vector.broadcast %53 : vector<1x512xi1> to vector<4x512xi1>
    %55 = vector.broadcast %cst_17 : f32 to vector<4x512xf32>
    %56 = arith.select %54, %52, %55 : vector<4x512xi1>, vector<4x512xf32>
    %c495_i32 = arith.constant 495 : i32
    %57 = tpu.dynamic_rotate %0 by %c495_i32 dim 1 : vector<4x512xf32>, i32 -> vector<4x512xf32>
    %58 = arith.andi %14, %18 : vector<1x512xi1>
    %cst_18 = arith.constant 0.000000e+00 : f32
    %59 = vector.shape_cast %58 : vector<1x512xi1> to vector<1x512xi1>
    %60 = vector.broadcast %59 : vector<1x512xi1> to vector<4x512xi1>
    %61 = vector.broadcast %cst_18 : f32 to vector<4x512xf32>
    %62 = arith.select %60, %57, %61 : vector<4x512xi1>, vector<4x512xf32>
    %63 = tpu.concatenate %24, %29, %35, %40, %0, %45, %51, %56, %62 in 0 : vector<4x512xf32>, vector<4x512xf32>, vector<4x512xf32>, vector<4x512xf32>, vector<4x512xf32>, vector<4x512xf32>, vector<4x512xf32>, vector<4x512xf32>, vector<4x512xf32> -> vector<36x512xf32>
    %cst_19 = arith.constant dense<0.000000e+00> : vector<8x512xf32>
    %64 = tpu.matmul %1, %63, %cst_19 {dimension_numbers = #tpu.dot_dimension_numbers<[1], [0], [0], [1], [0, 0, 1, 1], [], []>} : vector<8x36xf32>, vector<36x512xf32>, vector<8x512xf32> -> vector<8x512xf32>
    %cst_20 = arith.constant dense<0.000000e+00> : vector<8xf32>
    %65 = vector.multi_reduction <add>, %64, %cst_20 [1] : vector<8x512xf32> to vector<8xf32>
    %66 = vector.shape_cast %65 : vector<8xf32> to vector<8x1xf32>
    %cst_21 = arith.constant 0.001953125 : f32
    %67 = vector.broadcast %cst_21 : f32 to vector<8x1xf32>
    %68 = arith.mulf %66, %67 : vector<8x1xf32>
    %69 = vector.broadcast %68 : vector<8x1xf32> to vector<8x512xf32>
    %70 = arith.subf %64, %69 : vector<8x512xf32>
    %71 = arith.mulf %70, %70 : vector<8x512xf32>
    %cst_22 = arith.constant dense<0.000000e+00> : vector<8xf32>
    %72 = vector.multi_reduction <add>, %71, %cst_22 [1] : vector<8x512xf32> to vector<8xf32>
    %73 = vector.shape_cast %72 : vector<8xf32> to vector<8x1xf32>
    %cst_23 = arith.constant 0.001953125 : f32
    %74 = vector.broadcast %cst_23 : f32 to vector<8x1xf32>
    %75 = arith.mulf %73, %74 : vector<8x1xf32>
    %cst_24 = arith.constant 9.99999974E-6 : f32
    %76 = vector.broadcast %cst_24 : f32 to vector<8x1xf32>
    %77 = arith.addf %75, %76 : vector<8x1xf32>
    %78 = math.rsqrt %77 : vector<8x1xf32>
    %79 = arith.mulf %78, %2 : vector<8x1xf32>
    %80 = vector.broadcast %79 : vector<8x1xf32> to vector<8x512xf32>
    %81 = arith.mulf %70, %80 : vector<8x512xf32>
    %82 = vector.broadcast %3 : vector<8x1xf32> to vector<8x512xf32>
    %83 = arith.addf %81, %82 : vector<8x512xf32>
    %cst_25 = arith.constant 0.000000e+00 : f32
    %84 = vector.broadcast %cst_25 : f32 to vector<8x512xf32>
    %85 = arith.cmpf ogt, %83, %84 : vector<8x512xf32>
    %cst_26 = arith.constant 0.00999999977 : f32
    %86 = vector.broadcast %cst_26 : f32 to vector<8x512xf32>
    %87 = arith.mulf %86, %83 : vector<8x512xf32>
    %88 = arith.select %85, %83, %87 : vector<8x512xi1>, vector<8x512xf32>
    %c511_i32_27 = arith.constant 511 : i32
    %89 = tpu.dynamic_rotate %88 by %c511_i32_27 dim 1 : vector<8x512xf32>, i32 -> vector<8x512xf32>
    %90 = arith.maximumf %88, %89 : vector<8x512xf32>
    %c496_i32_28 = arith.constant 496 : i32
    %91 = tpu.dynamic_rotate %90 by %c496_i32_28 dim 1 : vector<8x512xf32>, i32 -> vector<8x512xf32>
    %92 = arith.maximumf %90, %91 : vector<8x512xf32>
    %93 = tpu.iota {dimensions = array<i32: 1>} : vector<1x128xi32>
    %c6_i32 = arith.constant 6 : i32
    %94 = vector.broadcast %c6_i32 : i32 to vector<1x128xi32>
    %95 = arith.shrsi %93, %94 : vector<1x128xi32>
    %c3_i32 = arith.constant 3 : i32
    %96 = vector.broadcast %c3_i32 : i32 to vector<1x128xi32>
    %97 = arith.shrsi %93, %96 : vector<1x128xi32>
    %c7_i32 = arith.constant 7 : i32
    %98 = vector.broadcast %c7_i32 : i32 to vector<1x128xi32>
    %99 = arith.andi %97, %98 : vector<1x128xi32>
    %c7_i32_29 = arith.constant 7 : i32
    %100 = vector.broadcast %c7_i32_29 : i32 to vector<1x128xi32>
    %101 = arith.andi %93, %100 : vector<1x128xi32>
    %c256_i32 = arith.constant 256 : i32
    %102 = vector.broadcast %c256_i32 : i32 to vector<1x128xi32>
    %103 = arith.muli %95, %102 : vector<1x128xi32>
    %c2_i32 = arith.constant 2 : i32
    %104 = vector.broadcast %c2_i32 : i32 to vector<1x128xi32>
    %105 = arith.muli %104, %99 : vector<1x128xi32>
    %c16_i32_30 = arith.constant 16 : i32
    %106 = vector.broadcast %c16_i32_30 : i32 to vector<1x128xi32>
    %107 = arith.muli %105, %106 : vector<1x128xi32>
    %108 = arith.addi %103, %107 : vector<1x128xi32>
    %c2_i32_31 = arith.constant 2 : i32
    %109 = vector.broadcast %c2_i32_31 : i32 to vector<1x128xi32>
    %110 = arith.muli %109, %101 : vector<1x128xi32>
    %111 = arith.addi %108, %110 : vector<1x128xi32>
    %112 = tpu.iota {dimensions = array<i32: 0>} : vector<512x1xi32>
    %113 = vector.broadcast %112 : vector<512x1xi32> to vector<512x128xi32>
    %114 = vector.broadcast %111 : vector<1x128xi32> to vector<512x128xi32>
    %115 = arith.cmpi eq, %113, %114 : vector<512x128xi32>
    %cst_32 = arith.constant 1.000000e+00 : f32
    %cst_33 = arith.constant 0.000000e+00 : f32
    %116 = vector.broadcast %cst_32 : f32 to vector<512x128xf32>
    %117 = vector.broadcast %cst_33 : f32 to vector<512x128xf32>
    %118 = arith.select %115, %116, %117 : vector<512x128xi1>, vector<512x128xf32>
    %cst_34 = arith.constant dense<0.000000e+00> : vector<8x128xf32>
    %119 = tpu.matmul %92, %118, %cst_34 {dimension_numbers = #tpu.dot_dimension_numbers<[1], [0], [0], [1], [0, 0, 1, 1], [], []>} : vector<8x512xf32>, vector<512x128xf32>, vector<8x128xf32> -> vector<8x128xf32>
    %c0_35 = arith.constant 0 : index
    %c0_36 = arith.constant 0 : index
    %120 = vector.load %arg4[%c0_35, %c0_36] : memref<8x72xf32, #tpu.memory_space<vmem>>, vector<8x72xf32>
    %c0_37 = arith.constant 0 : index
    %c0_38 = arith.constant 0 : index
    %121 = vector.load %arg5[%c0_37, %c0_38] : memref<8x1xf32, #tpu.memory_space<vmem>>, vector<8x1xf32>
    %c0_39 = arith.constant 0 : index
    %c0_40 = arith.constant 0 : index
    %122 = vector.load %arg6[%c0_39, %c0_40] : memref<8x1xf32, #tpu.memory_space<vmem>>, vector<8x1xf32>
    %123 = tpu.iota {dimensions = array<i32: 1>} : vector<1x128xi32>
    %c3_i32_41 = arith.constant 3 : i32
    %124 = vector.broadcast %c3_i32_41 : i32 to vector<1x128xi32>
    %125 = arith.shrsi %123, %124 : vector<1x128xi32>
    %c7_i32_42 = arith.constant 7 : i32
    %126 = vector.broadcast %c7_i32_42 : i32 to vector<1x128xi32>
    %127 = arith.andi %125, %126 : vector<1x128xi32>
    %c7_i32_43 = arith.constant 7 : i32
    %128 = vector.broadcast %c7_i32_43 : i32 to vector<1x128xi32>
    %129 = arith.andi %123, %128 : vector<1x128xi32>
    %c1_i32_44 = arith.constant 1 : i32
    %130 = vector.broadcast %c1_i32_44 : i32 to vector<1x128xi32>
    %131 = arith.cmpi sge, %127, %130 : vector<1x128xi32>
    %c6_i32_45 = arith.constant 6 : i32
    %132 = vector.broadcast %c6_i32_45 : i32 to vector<1x128xi32>
    %133 = arith.cmpi sle, %127, %132 : vector<1x128xi32>
    %c1_i32_46 = arith.constant 1 : i32
    %134 = vector.broadcast %c1_i32_46 : i32 to vector<1x128xi32>
    %135 = arith.cmpi sge, %129, %134 : vector<1x128xi32>
    %c6_i32_47 = arith.constant 6 : i32
    %136 = vector.broadcast %c6_i32_47 : i32 to vector<1x128xi32>
    %137 = arith.cmpi sle, %129, %136 : vector<1x128xi32>
    %c9_i32 = arith.constant 9 : i32
    %138 = tpu.dynamic_rotate %119 by %c9_i32 dim 1 : vector<8x128xf32>, i32 -> vector<8x128xf32>
    %139 = arith.andi %131, %135 : vector<1x128xi1>
    %cst_48 = arith.constant 0.000000e+00 : f32
    %140 = vector.shape_cast %139 : vector<1x128xi1> to vector<1x128xi1>
    %141 = vector.broadcast %140 : vector<1x128xi1> to vector<8x128xi1>
    %142 = vector.broadcast %cst_48 : f32 to vector<8x128xf32>
    %143 = arith.select %141, %138, %142 : vector<8x128xi1>, vector<8x128xf32>
    %c8_i32 = arith.constant 8 : i32
    %144 = tpu.dynamic_rotate %119 by %c8_i32 dim 1 : vector<8x128xf32>, i32 -> vector<8x128xf32>
    %cst_49 = arith.constant 0.000000e+00 : f32
    %145 = vector.shape_cast %131 : vector<1x128xi1> to vector<1x128xi1>
    %146 = vector.broadcast %145 : vector<1x128xi1> to vector<8x128xi1>
    %147 = vector.broadcast %cst_49 : f32 to vector<8x128xf32>
    %148 = arith.select %146, %144, %147 : vector<8x128xi1>, vector<8x128xf32>
    %c7_i32_50 = arith.constant 7 : i32
    %149 = tpu.dynamic_rotate %119 by %c7_i32_50 dim 1 : vector<8x128xf32>, i32 -> vector<8x128xf32>
    %150 = arith.andi %131, %137 : vector<1x128xi1>
    %cst_51 = arith.constant 0.000000e+00 : f32
    %151 = vector.shape_cast %150 : vector<1x128xi1> to vector<1x128xi1>
    %152 = vector.broadcast %151 : vector<1x128xi1> to vector<8x128xi1>
    %153 = vector.broadcast %cst_51 : f32 to vector<8x128xf32>
    %154 = arith.select %152, %149, %153 : vector<8x128xi1>, vector<8x128xf32>
    %c1_i32_52 = arith.constant 1 : i32
    %155 = tpu.dynamic_rotate %119 by %c1_i32_52 dim 1 : vector<8x128xf32>, i32 -> vector<8x128xf32>
    %cst_53 = arith.constant 0.000000e+00 : f32
    %156 = vector.shape_cast %135 : vector<1x128xi1> to vector<1x128xi1>
    %157 = vector.broadcast %156 : vector<1x128xi1> to vector<8x128xi1>
    %158 = vector.broadcast %cst_53 : f32 to vector<8x128xf32>
    %159 = arith.select %157, %155, %158 : vector<8x128xi1>, vector<8x128xf32>
    %c127_i32 = arith.constant 127 : i32
    %160 = tpu.dynamic_rotate %119 by %c127_i32 dim 1 : vector<8x128xf32>, i32 -> vector<8x128xf32>
    %cst_54 = arith.constant 0.000000e+00 : f32
    %161 = vector.shape_cast %137 : vector<1x128xi1> to vector<1x128xi1>
    %162 = vector.broadcast %161 : vector<1x128xi1> to vector<8x128xi1>
    %163 = vector.broadcast %cst_54 : f32 to vector<8x128xf32>
    %164 = arith.select %162, %160, %163 : vector<8x128xi1>, vector<8x128xf32>
    %c121_i32 = arith.constant 121 : i32
    %165 = tpu.dynamic_rotate %119 by %c121_i32 dim 1 : vector<8x128xf32>, i32 -> vector<8x128xf32>
    %166 = arith.andi %133, %135 : vector<1x128xi1>
    %cst_55 = arith.constant 0.000000e+00 : f32
    %167 = vector.shape_cast %166 : vector<1x128xi1> to vector<1x128xi1>
    %168 = vector.broadcast %167 : vector<1x128xi1> to vector<8x128xi1>
    %169 = vector.broadcast %cst_55 : f32 to vector<8x128xf32>
    %170 = arith.select %168, %165, %169 : vector<8x128xi1>, vector<8x128xf32>
    %c120_i32 = arith.constant 120 : i32
    %171 = tpu.dynamic_rotate %119 by %c120_i32 dim 1 : vector<8x128xf32>, i32 -> vector<8x128xf32>
    %cst_56 = arith.constant 0.000000e+00 : f32
    %172 = vector.shape_cast %133 : vector<1x128xi1> to vector<1x128xi1>
    %173 = vector.broadcast %172 : vector<1x128xi1> to vector<8x128xi1>
    %174 = vector.broadcast %cst_56 : f32 to vector<8x128xf32>
    %175 = arith.select %173, %171, %174 : vector<8x128xi1>, vector<8x128xf32>
    %c119_i32 = arith.constant 119 : i32
    %176 = tpu.dynamic_rotate %119 by %c119_i32 dim 1 : vector<8x128xf32>, i32 -> vector<8x128xf32>
    %177 = arith.andi %133, %137 : vector<1x128xi1>
    %cst_57 = arith.constant 0.000000e+00 : f32
    %178 = vector.shape_cast %177 : vector<1x128xi1> to vector<1x128xi1>
    %179 = vector.broadcast %178 : vector<1x128xi1> to vector<8x128xi1>
    %180 = vector.broadcast %cst_57 : f32 to vector<8x128xf32>
    %181 = arith.select %179, %176, %180 : vector<8x128xi1>, vector<8x128xf32>
    %182 = tpu.concatenate %143, %148, %154, %159, %119, %164, %170, %175, %181 in 0 : vector<8x128xf32>, vector<8x128xf32>, vector<8x128xf32>, vector<8x128xf32>, vector<8x128xf32>, vector<8x128xf32>, vector<8x128xf32>, vector<8x128xf32>, vector<8x128xf32> -> vector<72x128xf32>
    %cst_58 = arith.constant dense<0.000000e+00> : vector<8x128xf32>
    %183 = tpu.matmul %120, %182, %cst_58 {dimension_numbers = #tpu.dot_dimension_numbers<[1], [0], [0], [1], [0, 0, 1, 1], [], []>} : vector<8x72xf32>, vector<72x128xf32>, vector<8x128xf32> -> vector<8x128xf32>
    %cst_59 = arith.constant dense<0.000000e+00> : vector<8xf32>
    %184 = vector.multi_reduction <add>, %183, %cst_59 [1] : vector<8x128xf32> to vector<8xf32>
    %185 = vector.shape_cast %184 : vector<8xf32> to vector<8x1xf32>
    %cst_60 = arith.constant 7.812500e-03 : f32
    %186 = vector.broadcast %cst_60 : f32 to vector<8x1xf32>
    %187 = arith.mulf %185, %186 : vector<8x1xf32>
    %188 = vector.broadcast %187 : vector<8x1xf32> to vector<8x128xf32>
    %189 = arith.subf %183, %188 : vector<8x128xf32>
    %190 = arith.mulf %189, %189 : vector<8x128xf32>
    %cst_61 = arith.constant dense<0.000000e+00> : vector<8xf32>
    %191 = vector.multi_reduction <add>, %190, %cst_61 [1] : vector<8x128xf32> to vector<8xf32>
    %192 = vector.shape_cast %191 : vector<8xf32> to vector<8x1xf32>
    %cst_62 = arith.constant 7.812500e-03 : f32
    %193 = vector.broadcast %cst_62 : f32 to vector<8x1xf32>
    %194 = arith.mulf %192, %193 : vector<8x1xf32>
    %cst_63 = arith.constant 9.99999974E-6 : f32
    %195 = vector.broadcast %cst_63 : f32 to vector<8x1xf32>
    %196 = arith.addf %194, %195 : vector<8x1xf32>
    %197 = math.rsqrt %196 : vector<8x1xf32>
    %198 = arith.mulf %197, %121 : vector<8x1xf32>
    %199 = vector.broadcast %198 : vector<8x1xf32> to vector<8x128xf32>
    %200 = arith.mulf %189, %199 : vector<8x128xf32>
    %201 = vector.broadcast %122 : vector<8x1xf32> to vector<8x128xf32>
    %202 = arith.addf %200, %201 : vector<8x128xf32>
    %cst_64 = arith.constant 0.000000e+00 : f32
    %203 = vector.broadcast %cst_64 : f32 to vector<8x128xf32>
    %204 = arith.cmpf ogt, %202, %203 : vector<8x128xf32>
    %cst_65 = arith.constant 0.00999999977 : f32
    %205 = vector.broadcast %cst_65 : f32 to vector<8x128xf32>
    %206 = arith.mulf %205, %202 : vector<8x128xf32>
    %207 = arith.select %204, %202, %206 : vector<8x128xi1>, vector<8x128xf32>
    %c127_i32_66 = arith.constant 127 : i32
    %208 = tpu.dynamic_rotate %207 by %c127_i32_66 dim 1 : vector<8x128xf32>, i32 -> vector<8x128xf32>
    %209 = arith.maximumf %207, %208 : vector<8x128xf32>
    %c120_i32_67 = arith.constant 120 : i32
    %210 = tpu.dynamic_rotate %209 by %c120_i32_67 dim 1 : vector<8x128xf32>, i32 -> vector<8x128xf32>
    %211 = arith.maximumf %209, %210 : vector<8x128xf32>
    %212 = tpu.concatenate %211, %211, %211, %211, %211 in 0 : vector<8x128xf32>, vector<8x128xf32>, vector<8x128xf32>, vector<8x128xf32>, vector<8x128xf32> -> vector<40x128xf32>
    %c0_68 = arith.constant 0 : index
    %c0_69 = arith.constant 0 : index
    %213 = vector.load %arg7[%c0_68, %c0_69] : memref<40x128xf32, #tpu.memory_space<vmem>>, vector<40x128xf32>
    %214 = arith.mulf %212, %213 : vector<40x128xf32>
    %c0_70 = arith.constant 0 : index
    %c0_71 = arith.constant 0 : index
    %215 = vector.load %arg8[%c0_70, %c0_71] : memref<8x40xf32, #tpu.memory_space<vmem>>, vector<8x40xf32>
    %cst_72 = arith.constant dense<0.000000e+00> : vector<8x128xf32>
    %216 = tpu.matmul %215, %214, %cst_72 {dimension_numbers = #tpu.dot_dimension_numbers<[1], [0], [0], [1], [0, 0, 1, 1], [], []>} : vector<8x40xf32>, vector<40x128xf32>, vector<8x128xf32> -> vector<8x128xf32>
    %217 = tpu.iota {dimensions = array<i32: 0>} : vector<128x128xi32>
    %218 = tpu.iota {dimensions = array<i32: 1>} : vector<128x128xi32>
    %c6_i32_73 = arith.constant 6 : i32
    %219 = vector.broadcast %c6_i32_73 : i32 to vector<128x128xi32>
    %220 = arith.shrsi %217, %219 : vector<128x128xi32>
    %221 = arith.cmpi eq, %220, %218 : vector<128x128xi32>
    %cst_74 = arith.constant 1.000000e+00 : f32
    %cst_75 = arith.constant 0.000000e+00 : f32
    %222 = vector.broadcast %cst_74 : f32 to vector<128x128xf32>
    %223 = vector.broadcast %cst_75 : f32 to vector<128x128xf32>
    %224 = arith.select %221, %222, %223 : vector<128x128xi1>, vector<128x128xf32>
    %cst_76 = arith.constant dense<0.000000e+00> : vector<8x128xf32>
    %225 = tpu.matmul %216, %224, %cst_76 {dimension_numbers = #tpu.dot_dimension_numbers<[1], [0], [0], [1], [0, 0, 1, 1], [], []>} : vector<8x128xf32>, vector<128x128xf32>, vector<8x128xf32> -> vector<8x128xf32>
    %c0_77 = arith.constant 0 : index
    %c0_78 = arith.constant 0 : index
    %226 = vector.load %arg9[%c0_77, %c0_78] : memref<8x1xf32, #tpu.memory_space<vmem>>, vector<8x1xf32>
    %227 = vector.broadcast %226 : vector<8x1xf32> to vector<8x128xf32>
    %228 = arith.addf %225, %227 : vector<8x128xf32>
    %c0_79 = arith.constant 0 : index
    %c0_80 = arith.constant 0 : index
    %229 = vector.load %arg10[%c0_79, %c0_80] : memref<8x128xf32, #tpu.memory_space<vmem>>, vector<8x128xf32>
    tpu.vector_store %arg10[%c0_79, %c0_80], %228 {strides = array<i32>} : memref<8x128xf32, #tpu.memory_space<vmem>>, vector<8x128xf32>,
    return
  }
}

</mosaic_0001>

<bundles_post_ra>
// kernel: tile.7
= control target key start
LH: loop header
LB: loop body
LE: loop exit
PB: predicated region body
PF: predicated region fallthrough
CT: control target
= control target key end

     0   :  { %vm164_vm0 = vcmask 1047556   ;;  %s306_s15 = smov 64   ;;  %vm166_vm1 = vcmask 523264   ;;  %vm212_vm2 = vcmask 1048064   ;;  %s487_s0 = inlined_call_operand.vmem [shape: f32[40,2,64], index: 0, kind: input, shape index: {}]   ;;  %s488_s1 = inlined_call_operand.vmem [shape: f32[40,128], index: 1, kind: output, shape index: {}]  }
   0x1   :  { %v290_v0 = vld [vmem:[%s487_s0 + $0xe] sm:$0x3]  ;;  %v291_v1 = vld [vmem:[%s487_s0 + $0xc] sm:$0x3]  ;;  %v292_v2 = vld [vmem:[%s487_s0 + $0xa] sm:$0x3] }
   0x2   :  { %135 = vst [vmem:[#allocation0 + $0x38] sm:$0x3] %v290_v0  ;;  %v293_v3 = vld [vmem:[%s487_s0 + $0x8] sm:$0x3]  ;;  %v294_v4 = vld [vmem:[%s487_s0 + $0x6] sm:$0x3] }
   0x3   :  { %139 = vst [vmem:[#allocation0 + $0x30] sm:$0x3] %v291_v1  ;;  %v295_v5 = vld [vmem:[%s487_s0 + $0x4] sm:$0x3]  ;;  %v296_v6 = vld [vmem:[%s487_s0 + $0x2] sm:$0x3] }
   0x4   :  { %143 = vst [vmem:[#allocation0 + $0x28] sm:$0x3] %v292_v2  ;;  %v160_v7 = vld [vmem:[%s487_s0] sm:$0x3]  ;;  %v282_v8 = vld [vmem:[%s487_s0 + $0x1e] sm:$0x3] }
   0x5   :  { %147 = vst [vmem:[#allocation0 + $0x20] sm:$0x3] %v293_v3  ;;  %v283_v9 = vld [vmem:[%s487_s0 + $0x1c] sm:$0x3]  ;;  %v284_v10 = vld [vmem:[%s487_s0 + $0x1a] sm:$0x3] }
   0x6   :  { %151 = vst [vmem:[#allocation0 + $0x18] sm:$0x3] %v294_v4  ;;  %v285_v11 = vld [vmem:[%s487_s0 + $0x18] sm:$0x3]  ;;  %v286_v12 = vld [vmem:[%s487_s0 + $0x16] sm:$0x3] }
   0x7   :  { %155 = vst [vmem:[#allocation0 + $0x10] sm:$0x3] %v295_v5  ;;  %v287_v13 = vld [vmem:[%s487_s0 + $0x14] sm:$0x3]  ;;  %v288_v14 = vld [vmem:[%s487_s0 + $0x12] sm:$0x3] }
   0x8   :  { %159 = vst [vmem:[#allocation0 + $0x8] sm:$0x3] %v296_v6  ;;  %v289_v15 = vld [vmem:[%s487_s0 + $0x10] sm:$0x3]  ;;  %v274_v17 = vld [vmem:[%s487_s0 + $0x2e] sm:$0x3] }
   0x9   :  { %161 = vst [vmem:[#allocation0] sm:$0x3] %v160_v7  ;;  %v275_v18 = vld [vmem:[%s487_s0 + $0x2c] sm:$0x3]  ;;  %v276_v21 = vld [vmem:[%s487_s0 + $0x2a] sm:$0x3] }
   0xa   :  { %103 = vst [vmem:[#allocation0 + $0x78] sm:$0x3] %v282_v8  ;;  %v277_v22 = vld [vmem:[%s487_s0 + $0x28] sm:$0x3]  ;;  %v278_v23 = vld [vmem:[%s487_s0 + $0x26] sm:$0x3] }
   0xb   :  { %107 = vst [vmem:[#allocation0 + $0x70] sm:$0x3] %v283_v9  ;;  %v279_v24 = vld [vmem:[%s487_s0 + $0x24] sm:$0x3]  ;;  %v280_v25 = vld [vmem:[%s487_s0 + $0x22] sm:$0x3] }
   0xc   :  { %111 = vst [vmem:[#allocation0 + $0x68] sm:$0x3] %v284_v10  ;;  %v207_v16 = vld [vmem:[#allocation0 + $0x1] ss:$8 sm:$0xf0]  }
   0xd   :  { %115 = vst [vmem:[#allocation0 + $0x60] sm:$0x3] %v285_v11  ;;  %v281_v26 = vld [vmem:[%s487_s0 + $0x20] sm:$0x3]  ;;  %v258_v28 = vld [vmem:[%s487_s0 + $0x4e] sm:$0x3] }
   0xe   :  { %119 = vst [vmem:[#allocation0 + $0x58] sm:$0x3] %v286_v12  ;;  %v259_v29 = vld [vmem:[%s487_s0 + $0x4c] sm:$0x3]  ;;  %v260_v32 = vld [vmem:[%s487_s0 + $0x4a] sm:$0x3] }
   0xf   :  { %123 = vst [vmem:[#allocation0 + $0x50] sm:$0x3] %v287_v13  ;;  %v261_v33 = vld [vmem:[%s487_s0 + $0x48] sm:$0x3]  ;;  %v262_v34 = vld [vmem:[%s487_s0 + $0x46] sm:$0x3] }
  0x10   :  { %v205_v19 = vld [vmem:[#allocation0 + $0x1] ss:$8 sm:$0xf]   ;;  %127 = vst [vmem:[#allocation0 + $0x48] sm:$0x3] %v288_v14 }
  0x11   :  { %v209_v20 = vsel %vm164_vm0, %v207_v16, %v205_v19  ;;  %131 = vst [vmem:[#allocation0 + $0x40] sm:$0x3] %v289_v15  ;;  %v263_v35 = vld [vmem:[%s487_s0 + $0x44] sm:$0x3]  ;;  %v264_v36 = vld [vmem:[%s487_s0 + $0x42] sm:$0x3] }
  0x12   :  { %210 = vrot.lane.b32.xlu0 %v209_v20, %s306_s15  ;;  %71 = vst [vmem:[#allocation0 + $0xb8] sm:$0x3] %v274_v17  ;;  %v265_v37 = vld [vmem:[%s487_s0 + $0x40] sm:$0x3]  ;;  %v266_v39 = vld [vmem:[%s487_s0 + $0x3e] sm:$0x3] }
  0x13   :  { %75 = vst [vmem:[#allocation0 + $0xb0] sm:$0x3] %v275_v18  ;;  %v267_v40 = vld [vmem:[%s487_s0 + $0x3c] sm:$0x3]  ;;  %v268_v43 = vld [vmem:[%s487_s0 + $0x3a] sm:$0x3] }
  0x14   :  { %79 = vst [vmem:[#allocation0 + $0xa8] sm:$0x3] %v276_v21  ;;  %v228_v27 = vld [vmem:[#allocation0 + $0x41] ss:$8 sm:$0xf0]  }
  0x15   :  { %83 = vst [vmem:[#allocation0 + $0xa0] sm:$0x3] %v277_v22  ;;  %v269_v44 = vld [vmem:[%s487_s0 + $0x38] sm:$0x3]  ;;  %v270_v45 = vld [vmem:[%s487_s0 + $0x36] sm:$0x3] }
  0x16   :  { %87 = vst [vmem:[#allocation0 + $0x98] sm:$0x3] %v278_v23  ;;  %v271_v46 = vld [vmem:[%s487_s0 + $0x34] sm:$0x3]  ;;  %v272_v47 = vld [vmem:[%s487_s0 + $0x32] sm:$0x3] }
  0x17   :  { %91 = vst [vmem:[#allocation0 + $0x90] sm:$0x3] %v279_v24  ;;  %v273_v48 = vld [vmem:[%s487_s0 + $0x30] sm:$0x3] }
  0x18   :  { %v226_v30 = vld [vmem:[#allocation0 + $0x41] ss:$8 sm:$0xf]   ;;  %95 = vst [vmem:[#allocation0 + $0x88] sm:$0x3] %v280_v25 }
  0x19   :  { %v230_v31 = vsel %vm164_vm0, %v228_v27, %v226_v30  ;;  %99 = vst [vmem:[#allocation0 + $0x80] sm:$0x3] %v281_v26  ;;  %v162_v55 = vld [vmem:[#allocation0] ss:$8 sm:$0xf]  }
  0x1a   :  { %231 = vrot.lane.b32.xlu1 %v230_v31, %s306_s15  ;;  %7 = vst [vmem:[#allocation0 + $0x138] sm:$0x3] %v258_v28  ;;  %v163_v56 = vld [vmem:[#allocation0] ss:$8 sm:$0xf0]  }
  0x1b   :  { %11 = vst [vmem:[#allocation0 + $0x130] sm:$0x3] %v259_v29  ;;  %v165_v57 = vsel %vm164_vm0, %v163_v56, %v162_v55  ;;  %v169_v58 = vld [vmem:[#allocation0 + $0x40] ss:$8 sm:$0xf]  }
  0x1c   :  { %15 = vst [vmem:[#allocation0 + $0x128] sm:$0x3] %v260_v32  ;;  %v239_v38 = vld [vmem:[#allocation0 + $0x81] ss:$8 sm:$0xf0]  }
  0x1d   :  { %19 = vst [vmem:[#allocation0 + $0x120] sm:$0x3] %v261_v33  ;;  %v171_v59 = vld [vmem:[#allocation0 + $0x40] ss:$8 sm:$0xf0]  }
  0x1e   :  { %23 = vst [vmem:[#allocation0 + $0x118] sm:$0x3] %v262_v34  ;;  %v173_v60 = vsel %vm164_vm0, %v171_v59, %v169_v58  ;;  %v180_v62 = vld [vmem:[#allocation0 + $0x80] ss:$8 sm:$0xf0]  }
  0x1f   :  { %27 = vst [vmem:[#allocation0 + $0x110] sm:$0x3] %v263_v35 }
  0x20   :  { %v237_v41 = vld [vmem:[#allocation0 + $0x81] ss:$8 sm:$0xf]   ;;  %31 = vst [vmem:[#allocation0 + $0x108] sm:$0x3] %v264_v36 }
  0x21   :  { %v241_v42 = vsel %vm164_vm0, %v239_v38, %v237_v41  ;;  %35 = vst [vmem:[#allocation0 + $0x100] sm:$0x3] %v265_v37  ;;  %v178_v61 = vld [vmem:[#allocation0 + $0x80] ss:$8 sm:$0xf]  }
  0x22   :  { %242 = vrot.lane.b32.xlu1 %v241_v42, %s306_s15  ;;  %39 = vst [vmem:[#allocation0 + $0xf8] sm:$0x3] %v266_v39  ;;  %v182_v63 = vsel %vm164_vm0, %v180_v62, %v178_v61 }
  0x23   :  { %43 = vst [vmem:[#allocation0 + $0xf0] sm:$0x3] %v267_v40 }
  0x24   :  { %47 = vst [vmem:[#allocation0 + $0xe8] sm:$0x3] %v268_v43  ;;  %v217_v49 = vld [vmem:[#allocation0 + $0x101] ss:$8 sm:$0xf0]  }
  0x25   :  { %51 = vst [vmem:[#allocation0 + $0xe0] sm:$0x3] %v269_v44  ;;  %v198_v4 = vld [vmem:[#allocation0 + $0x100] ss:$8 sm:$0xf0]  }
  0x26   :  { %55 = vst [vmem:[#allocation0 + $0xd8] sm:$0x3] %v270_v45 }
  0x27   :  { %59 = vst [vmem:[#allocation0 + $0xd0] sm:$0x3] %v271_v46 }
  0x28   :  { %v215_v50 = vld [vmem:[#allocation0 + $0x101] ss:$8 sm:$0xf]   ;;  %63 = vst [vmem:[#allocation0 + $0xc8] sm:$0x3] %v272_v47 }
  0x29   :  { %v219_v51 = vsel %vm164_vm0, %v217_v49, %v215_v50  ;;  %67 = vst [vmem:[#allocation0 + $0xc0] sm:$0x3] %v273_v48  ;;  %v196_v3 = vld [vmem:[#allocation0 + $0x100] ss:$8 sm:$0xf]  }
  0x2a   :  { %220 = vrot.lane.b32.xlu0 %v219_v51, %s306_s15  ;;  %167 = vst.msk [vmem:[%s488_s1] sm:$0xff] %vm166_vm1, %v165_v57   ;;  %v200_v5 = vsel %vm164_vm0, %v198_v4, %v196_v3 }
  0x2b   :  { %297 = vst.msk [vmem:[%s488_s1 + $0x8] sm:$0xff] %vm166_vm1, %v173_v60  }
  0x2c   :  { %v250_v52 = vld [vmem:[#allocation0 + $0xc1] ss:$8 sm:$0xf0]   ;;  %v189_v1 = vld [vmem:[#allocation0 + $0xc0] ss:$8 sm:$0xf0]  }
  0x2d   :  { %298 = vst.msk [vmem:[%s488_s1 + $0x10] sm:$0xff] %vm166_vm1, %v182_v63  }
  0x2e   :  { %300 = vst.msk [vmem:[%s488_s1 + $0x20] sm:$0xff] %vm166_vm1, %v200_v5  }
  0x30   :  { %v248_v53 = vld [vmem:[#allocation0 + $0xc1] ss:$8 sm:$0xf]   ;;  %v187_v0 = vld [vmem:[#allocation0 + $0xc0] ss:$8 sm:$0xf]  }
  0x31   :  { %v252_v54 = vsel %vm164_vm0, %v250_v52, %v248_v53  ;;  %v191_v2 = vsel %vm164_vm0, %v189_v1, %v187_v0 }
  0x32   :  { %253 = vrot.lane.b32.xlu2 %v252_v54, %s306_s15  ;;  %299 = vst.msk [vmem:[%s488_s1 + $0x18] sm:$0xff] %vm166_vm1, %v191_v2  }
  0x84   :  { %v211_v6 = vpop.permute.xlu0 %210  }
  0x85   :  { %213 = vst.msk [vmem:[%s488_s1] sm:$0xff] %vm212_vm2, %v211_v6  }
  0x8c   :  { %v232_v7 = vpop.permute.xlu1 %231   ;;  %v254_v8 = vpop.permute.xlu2 %253  }
  0x8d   :  { %302 = vst.msk [vmem:[%s488_s1 + $0x8] sm:$0xff] %vm212_vm2, %v232_v7  }
  0x8e   :  { %304 = vst.msk [vmem:[%s488_s1 + $0x18] sm:$0xff] %vm212_vm2, %v254_v8  }
  0x94   :  { %v243_v9 = vpop.permute.xlu1 %242  }
  0x95   :  { %303 = vst.msk [vmem:[%s488_s1 + $0x10] sm:$0xff] %vm212_vm2, %v243_v9  }
  0x9c   :  { %v221_v10 = vpop.permute.xlu0 %220  }
  0x9d   :  { %301 = vst.msk [vmem:[%s488_s1 + $0x20] sm:$0xff] %vm212_vm2, %v221_v10  }

// kernel: vgg_forward.1
= control target key start
LH: loop header
LB: loop body
LE: loop exit
PB: predicated region body
PF: predicated region fallthrough
CT: control target
= control target key end

     0   :  { %s1368_s17 = smov 17   ;;  %s1370_s18 = smov 15   ;;  %v40_v50 = vlaneseq  ;;  %vm2464_vm12 = vcmask 1043456   ;;  %s2446_s0 = inlined_call_operand.vmem [shape: f32[4,512], index: 0, kind: input, shape index: {}]   ;;  %s2447_s1 = inlined_call_operand.vmem [shape: f32[8,36], index: 1, kind: input, shape index: {}]   ;;  %s2448_s2 = inlined_call_operand.vmem [shape: f32[8,1], index: 2, kind: input, shape index: {}]   ;;  %s2449_s3 = inlined_call_operand.vmem [shape: f32[8,1], index: 3, kind: input, shape index: {}]   ;;  %s2450_s4 = inlined_call_operand.vmem [shape: f32[8,72], index: 4, kind: input, shape index: {}]   ;;  %s2451_s9 = inlined_call_operand.vmem [shape: f32[8,1], index: 9, kind: input, shape index: {}]   ;;  %s2452_s5 = inlined_call_operand.vmem [shape: f32[8,1], index: 5, kind: input, shape index: {}]   ;;  %s2453_s6 = inlined_call_operand.vmem [shape: f32[8,1], index: 6, kind: input, shape index: {}]   ;;  %s2454_s7 = inlined_call_operand.vmem [shape: f32[40,128], index: 7, kind: input, shape index: {}]   ;;  %s2455_s8 = inlined_call_operand.vmem [shape: f32[8,40], index: 8, kind: input, shape index: {}]   ;;  %s2456_s10 = inlined_call_operand.vmem [shape: f32[8,128], index: 10, kind: output, shape index: {}]  }
   0x1   :  { %v1442_v0 = vld [vmem:[%s2446_s0] sm:$0xff]  ;;  %v1447_v1 = vld [vmem:[%s2446_s0 + $0x8] sm:$0xff]  ;;  %s1369_s0 = smov 16   ;;  %s1371_s19 = smov 1  }
   0x2   :  { %75 = vst [vmem:[#allocation1] ss:$2 sm:$0xff] %v1442_v0  ;;  %s1372_s20 = smov 127   ;;  %s1373_s21 = smov 113   ;;  %v1506_v52 = vand.u32 127, %v40_v50 }
   0x3   :  { %77 = vst [vmem:[#allocation1 + $0x10] ss:$2 sm:$0xff] %v1447_v1  ;;  %s1374_s22 = smov 112   ;;  %s1375_s23 = smov 111  }
   0x4   :  { %v43_v55 = vadd.s32 256, %v1506_v52  ;;  %v1516_v58 = vadd.s32 128, %v1506_v52  ;;  %vm2463_vm0 = vcmp.lt.s32.totalorder %v1506_v52, 1  ;;  %vm2457_vm1 = vcmp.lt.s32.totalorder %v1506_v52, 16  ;;  %s1380_s29 = smov 119   ;;  %s1381_s30 = smov 8  }
   0x5   :  { %vm2459_vm4 = vcmp.lt.s32.totalorder %v1506_v52, 17  ;;  %vm2458_vm6 = vcmp.lt.s32.totalorder %v1506_v52, 15  ;;  %vm2462_vm7 = vcmp.lt.s32.totalorder %v1506_v52, 112  ;;  %vm2461_vm10 = vcmp.lt.s32.totalorder %v1506_v52, 113  ;;  %s1382_s11 = smov 7   ;;  %s1383_s12 = smov 9  }
   0x6   :  { %v47_v56 = vshra.s32 %v43_v55, 4  ;;  %v55_v60 = vand.u32 15, %v43_v55  ;;  %vm2460_vm11 = vcmp.lt.s32.totalorder %v1506_v52, 127 }
   0x8   :  { %vm1534_vm2 = vcmp.ge.s32.totalorder %v55_v60, 1  ;;  %vm1553_vm5 = vcmp.le.s32.totalorder %v55_v60, 14 }
   0x9   :  { %v79_v2 = vld.sshfl [vmem:[#allocation1 + $0x8] sm:$0xff pattern:$0x75316420]  ;;  %v1451_v3 = vld.sshfl [vmem:[#allocation1] sm:$0xff pattern:$0x75316420] }
   0xa   :  { %v80_v4 = vld.sshfl [vmem:[#allocation1 + $0x10] sm:$0xff pattern:$0x75316420]  ;;  %v1453_v5 = vld.sshfl [vmem:[#allocation1 + $0x18] sm:$0xff pattern:$0x75316420] }
   0xb   :  { %117 = vst [vmem:[#allocation1 + $0x10] ss:$2 sm:$0xff] %v1447_v1  ;;  %v1272_v6 = vpack.i.bf16 %v80_v4, %v79_v2  ;;  %v1337_v43 = vpack.i.bf16 %v1451_v3, %v1453_v5  ;;  %v44_v2 = vadd.s32 384, %v1506_v52  ;;  %v46_v4 = vshra.s32 %v1516_v58, 4 }
   0xc   :  { %115 = vst [vmem:[#allocation1] ss:$2 sm:$0xff] %v1442_v0 }
   0xd   :  { %1273 = vrot.lane.b32.xlu2 %v1272_v6, %s1368_s17 }
  0x12   :  { %v120_v7 = vld.sshfl [vmem:[#allocation1 + $0x10] sm:$0xff pattern:$0x75316420]  ;;  %v1458_v8 = vld.sshfl [vmem:[#allocation1 + $0x18] sm:$0xff pattern:$0x75316420] }
  0x13   :  { %153 = vst [vmem:[#allocation1 + $0x10] ss:$2 sm:$0xff] %v1447_v1  ;;  %v1461_v9 = vld.sshfl [vmem:[#allocation1] sm:$0xff pattern:$0x75316420] }
  0x14   :  { %v119_v10 = vld.sshfl [vmem:[#allocation1 + $0x8] sm:$0xff pattern:$0x75316420]  ;;  %v1327_v37 = vpack.i.bf16 %v1461_v9, %v1458_v8 }
  0x15   :  { %151 = vst [vmem:[#allocation1] ss:$2 sm:$0xff] %v1442_v0  ;;  %v1277_v11 = vpack.i.bf16 %v120_v7, %v119_v10  ;;  %v48_v10 = vshra.s32 %v44_v2, 4 }
  0x17   :  { %1278 = vrot.lane.b32.xlu0 %v1277_v11, %s1369_s0 }
  0x1a   :  { %v156_v12 = vld.sshfl [vmem:[#allocation1 + $0x10] sm:$0xff pattern:$0x75316420]  ;;  %v1465_v13 = vld.sshfl [vmem:[#allocation1 + $0x18] sm:$0xff pattern:$0x75316420] }
  0x1b   :  { %193 = vst [vmem:[#allocation1 + $0x10] ss:$2 sm:$0xff] %v1447_v1 }
  0x1c   :  { %v1468_v14 = vld.sshfl [vmem:[#allocation1] sm:$0xff pattern:$0x75316420]  ;;  %v155_v15 = vld.sshfl [vmem:[#allocation1 + $0x8] sm:$0xff pattern:$0x75316420] }
  0x1d   :  { %191 = vst [vmem:[#allocation1] ss:$2 sm:$0xff] %v1442_v0  ;;  %v1282_v16 = vpack.i.bf16 %v156_v12, %v155_v15  ;;  %v1332_v47 = vpack.i.bf16 %v1468_v14, %v1465_v13  ;;  %v1557_v13 = vand.u32 15, %v46_v4  ;;  %v54_v14 = vand.u32 15, %v1516_v58 }
  0x1f   :  { %1283 = vrot.lane.b32.xlu1 %v1282_v16, %s1370_s18  ;;  %vm1641_vm15 = vcmp.ge.s32.totalorder %v54_v14, 1 }
  0x22   :  { %v196_v17 = vld.sshfl [vmem:[#allocation1 + $0x10] sm:$0xff pattern:$0x75316420]  ;;  %v197_v18 = vld.sshfl [vmem:[#allocation1 + $0x18] sm:$0xff pattern:$0x75316420] }
  0x23   :  { %229 = vst [vmem:[#allocation1 + $0x10] ss:$2 sm:$0xff] %v1447_v1 }
  0x24   :  { %v195_v19 = vld.sshfl [vmem:[#allocation1 + $0x8] sm:$0xff pattern:$0x75316420]  ;;  %v194_v20 = vld.sshfl [vmem:[#allocation1] sm:$0xff pattern:$0x75316420] }
  0x25   :  { %v1287_v21 = vpack.i.bf16 %v196_v17, %v195_v19  ;;  %227 = vst [vmem:[#allocation1] ss:$2 sm:$0xff] %v1442_v0  ;;  %v1322_v36 = vpack.i.bf16 %v194_v20, %v197_v18 }
  0x27   :  { %1288 = vrot.lane.b32.xlu2 %v1287_v21, %s1371_s19  ;;  %v56_v21 = vand.u32 15, %v44_v2 }
  0x2a   :  { %v232_v22 = vld.sshfl [vmem:[#allocation1 + $0x10] sm:$0xff pattern:$0x75316420]  ;;  %v233_v23 = vld.sshfl [vmem:[#allocation1 + $0x18] sm:$0xff pattern:$0x75316420] }
  0x2b   :  { %v1292_v24 = vpack.i.bf16 %v233_v23, %v232_v22  ;;  %265 = vst [vmem:[#allocation1 + $0x10] ss:$2 sm:$0xff] %v1447_v1 }
  0x2c   :  { %v230_v25 = vld.sshfl [vmem:[#allocation1] sm:$0xff pattern:$0x75316420]  ;;  %v231_v26 = vld.sshfl [vmem:[#allocation1 + $0x8] sm:$0xff pattern:$0x75316420] }
  0x2d   :  { %v1297_v27 = vpack.i.bf16 %v231_v26, %v230_v25  ;;  %263 = vst [vmem:[#allocation1] ss:$2 sm:$0xff] %v1442_v0  ;;  %1293 = vrot.lane.b32.xlu1 %v1292_v24, %s1372_s20 }
  0x2f   :  { %1298 = vrot.lane.b32.xlu2 %v1297_v27, %s1372_s20 }
  0x32   :  { %v268_v28 = vld.sshfl [vmem:[#allocation1 + $0x10] sm:$0xff pattern:$0x75316420]  ;;  %v269_v29 = vld.sshfl [vmem:[#allocation1 + $0x18] sm:$0xff pattern:$0x75316420] }
  0x33   :  { %305 = vst [vmem:[#allocation1 + $0x10] ss:$2 sm:$0xff] %v1447_v1  ;;  %v1302_v30 = vpack.i.bf16 %v269_v29, %v268_v28 }
  0x34   :  { %v266_v31 = vld.sshfl [vmem:[#allocation1] sm:$0xff pattern:$0x75316420]  ;;  %v267_v32 = vld.sshfl [vmem:[#allocation1 + $0x8] sm:$0xff pattern:$0x75316420] }
  0x35   :  { %303 = vst [vmem:[#allocation1] ss:$2 sm:$0xff] %v1442_v0  ;;  %v1317_v46 = vpack.i.bf16 %v267_v32, %v266_v31  ;;  %v45_v32 = vshra.s32 %v1506_v52, 4 }
  0x37   :  { %1303 = vrot.lane.b32.xlu2 %v1302_v30, %s1373_s21 }
  0x3a   :  { %v308_v33 = vld.sshfl [vmem:[#allocation1 + $0x10] sm:$0xff pattern:$0x75316420]  ;;  %v309_v34 = vld.sshfl [vmem:[#allocation1 + $0x18] sm:$0xff pattern:$0x75316420] }
  0x3b   :  { %v1307_v35 = vpack.i.bf16 %v309_v34, %v308_v33  ;;  %341 = vst [vmem:[#allocation1 + $0x10] ss:$2 sm:$0xff] %v1447_v1 }
  0x3c   :  { %v306_v38 = vld.sshfl [vmem:[#allocation1] sm:$0xff pattern:$0x75316420]  ;;  %v307_v39 = vld.sshfl [vmem:[#allocation1 + $0x8] sm:$0xff pattern:$0x75316420] }
  0x3d   :  { %1308 = vrot.lane.b32.xlu0 %v1307_v35, %s1374_s22  ;;  %339 = vst [vmem:[#allocation1] ss:$2 sm:$0xff] %v1442_v0  ;;  %v1312_v40 = vpack.i.bf16 %v307_v39, %v306_v38 }
  0x3f   :  { %1323 = vrot.lane.b32.xlu2 %v1322_v36, %s1371_s19 }
  0x42   :  { %v345_v41 = vld.sshfl [vmem:[#allocation1 + $0x18] sm:$0xff pattern:$0x75316420]  ;;  %v344_v42 = vld.sshfl [vmem:[#allocation1 + $0x10] sm:$0xff pattern:$0x75316420] }
  0x43   :  { %356 = vrot.lane.b32.xlu1 %v345_v41, %s1375_s23  ;;  %405 = vst [vmem:[#allocation1 + $0x10] ss:$2 sm:$0xff] %v1447_v1 }
  0x44   :  { %v342_v44 = vld.sshfl [vmem:[#allocation1] sm:$0xff pattern:$0x75316420]  ;;  %v343_v45 = vld.sshfl [vmem:[#allocation1 + $0x8] sm:$0xff pattern:$0x75316420] }
  0x45   :  { %1313 = vrot.lane.b32.xlu0 %v1312_v40, %s1374_s22  ;;  %403 = vst [vmem:[#allocation1] ss:$2 sm:$0xff] %v1442_v0  ;;  %v1522_v0 = vand.u32 15, %v47_v56  ;;  %v53_v40 = vand.u32 15, %v1506_v52  ;;  %v1652_v56 = vand.u32 15, %v45_v32 }
  0x47   :  { %1338 = vrot.lane.b32.xlu2 %v1337_v43, %s1368_s17  ;;  %vm59_vm3 = vcmp.ge.s32.totalorder %v1522_v0, 1  ;;  %vm63_vm9 = vcmp.le.s32.totalorder %v1522_v0, 14 }
  0x48   :  { %vm1584_vm8 = vmand %vm59_vm3, %vm1534_vm2 }
  0x49   :  { %vm1609_vm13 = vmand %vm59_vm3, %vm1553_vm5 }
  0x4a   :  { %vm1625_vm14 = vmand %vm63_vm9, %vm1534_vm2 }
  0x4b   :  { %350 = vrot.lane.b32.xlu1 %v342_v44, %s1375_s23 }
  0x4d   :  { %354 = vrot.lane.b32.xlu0 %v344_v42, %s1375_s23  ;;  %v1636_v42 = vand.u32 15, %v48_v10 }
  0x53   :  { %352 = vrot.lane.b32.xlu1 %v343_v45, %s1375_s23 }
  0x55   :  { %1318 = vrot.lane.b32.xlu0 %v1317_v46, %s1373_s21 }
  0x5b   :  { %1333 = vrot.lane.b32.xlu1 %v1332_v47, %s1370_s18 }
  0x5d   :  { %1328 = vrot.lane.b32.xlu0 %v1327_v37, %s1369_s0 }
  0x67   :  { %v1499_v48 = vpop.permute.xlu2 %1273 }
  0x68   :  { %v1276_v5 = vunpack.i.h.bf16 %v1499_v48  ;;  %v1275_v6 = vunpack.i.l.bf16 %v1499_v48 }
  0x6a   :  { %v96_v16 = vsel %vm2459_vm4, %v1275_v6, %v1276_v5  ;;  %vm1738_vm4 = vcmp.ge.s32.totalorder %v53_v40, 1 }
  0x6b   :  { %v113_v37 = vsel %vm1584_vm8, %v96_v16, 0.0  ;;  %vm1665_vm8 = vcmp.le.s32.totalorder %v56_v21, 14 }
  0x81   :  { %v1501_v49 = vpop.permute.xlu2 %1288 }
  0x82   :  { %v1291_v59 = vunpack.i.h.bf16 %v1501_v49  ;;  %v1290_v61 = vunpack.i.l.bf16 %v1501_v49  ;;  %v408_v49 = vld.sshfl [vmem:[#allocation1 + $0x10] sm:$0xff pattern:$0x75316420] }
  0x84   :  { %v212_v8 = vsel %vm2463_vm0, %v1290_v61, %v1291_v59 }
  0x85   :  { %v225_v15 = vsel %vm1534_vm2, %v212_v8, 0.0  ;;  %vm1645_vm2 = vcmp.ge.s32.totalorder %v56_v21, 1 }
  0x86   :  { %v397_v36 = vrot.slane %v225_v15, 4 }
  0x89   :  { %v1508_v53 = vpop.permute.xlu2 %1298  ;;  %v1510_v54 = vpop.permute.xlu0 %1278 }
  0x8a   :  { %v1281_v62 = vunpack.i.h.bf16 %v1510_v54  ;;  %v1280_v63 = vunpack.i.l.bf16 %v1510_v54  ;;  %v1301_v11 = vunpack.i.h.bf16 %v1508_v53  ;;  %v1300_v30 = vunpack.i.l.bf16 %v1508_v53 }
  0x8c   :  { %v136_v9 = vsel %vm2457_vm1, %v1280_v63, %v1281_v62  ;;  %vm358_vm1 = vcmp.lt.s32.totalorder %v1506_v52, 111 }
  0x8d   :  { %v149_v17 = vsel %vm59_vm3, %v136_v9, 0.0  ;;  %vm1659_vm3 = vcmp.le.s32.totalorder %v54_v14, 14  ;;  %v249_v14 = vsel %vm2460_vm11, %v1300_v30, %v1301_v11 }
  0x8e   :  { %v385_v33 = vrot.slane %v149_v17, 4 }
  0x91   :  { %v1503_v51 = vpop.permute.xlu1 %1283  ;;  %v1524_v1 = vpop.permute.xlu2 %1303 }
  0x92   :  { %v1306_v22 = vunpack.i.h.bf16 %v1524_v1  ;;  %v1305_v23 = vunpack.i.l.bf16 %v1524_v1  ;;  %v1286_v24 = vunpack.i.h.bf16 %v1503_v51  ;;  %v1285_v25 = vunpack.i.l.bf16 %v1503_v51 }
  0x94   :  { %v283_v38 = vsel %vm2461_vm10, %v1305_v23, %v1306_v22  ;;  %v172_v41 = vsel %vm2458_vm6, %v1285_v25, %v1286_v24  ;;  %vm1674_vm6 = vmand %vm63_vm9, %vm1553_vm5 }
  0x95   :  { %v301_v60 = vsel %vm1625_vm14, %v283_v38, 0.0  ;;  %v189_v4 = vsel %vm1609_vm13, %v172_v41, 0.0  ;;  %vm1680_vm14 = vcmp.le.s32.totalorder %v53_v40, 14  ;;  %vm64_vm13 = vcmp.le.s32.totalorder %v1636_v42, 14 }
  0x96   :  { %v445_v26 = vsel %vm2464_vm12, %v189_v4, %v397_v36 }
  0x99   :  { %v1595_v31 = vpop.permute.xlu2 %1323 }
  0x9a   :  { %v1326_v43 = vunpack.i.h.bf16 %v1595_v31  ;;  %v1325_v47 = vunpack.i.l.bf16 %v1595_v31 }
  0x9c   :  { %v1696_v12 = vsel %vm2463_vm0, %v1326_v43, %v1290_v61 }
  0x9d   :  { %v224_v36 = vsel %vm1641_vm15, %v1696_v12, 0.0 }
  0x9f   :  { %v1513_v57 = vpop.permute.xlu1 %1293 }
  0xa0   :  { %v1296_v27 = vunpack.i.h.bf16 %v1513_v57  ;;  %v1295_v28 = vunpack.i.l.bf16 %v1513_v57  ;;  %v1655_v57 = vsel %vm2464_vm12, %v113_v37, %v385_v33  ;;  %v259_v33 = vsel %vm1680_vm14, %v249_v14, 0.0 }
  0xa1   :  { %v1719_v35 = vpop.permute.xlu2 %1338  ;;  %v418_v39 = vrot.slane %v259_v33, 4 }
  0xa2   :  { %v247_v44 = vsel %vm2460_vm11, %v1295_v28, %v1296_v27  ;;  %v1341_v41 = vunpack.i.h.bf16 %v1719_v35 }
  0xa3   :  { %v261_v9 = vsel %vm1553_vm5, %v247_v44, 0.0  ;;  %vm61_vm5 = vcmp.le.s32.totalorder %v1652_v56, 14  ;;  %v1340_v44 = vunpack.i.l.bf16 %v1719_v35 }
  0xa4   :  { %v420_v32 = vrot.slane %v261_v9, 4  ;;  %vm1787_vm10 = vmand %vm61_vm5, %vm1738_vm4 }
  0xaf   :  { %v1529_v3 = vpop.permute.xlu0 %1308 }
  0xb0   :  { %v1311_v18 = vunpack.i.h.bf16 %v1529_v3  ;;  %v1310_v19 = vunpack.i.l.bf16 %v1529_v3  ;;  %v449_v3 = vsel %vm2464_vm12, %v408_v49, %v420_v32 }
  0xb2   :  { %v323_v34 = vsel %vm2462_vm7, %v1310_v19, %v1311_v18 }
  0xb3   :  { %v337_v55 = vsel %vm63_vm9, %v323_v34, 0.0  ;;  %v248_v34 = vsel %vm2460_vm11, %v1301_v11, %v1295_v28  ;;  %vm62_vm9 = vcmp.le.s32.totalorder %v1557_v13, 14 }
  0xb4   :  { %v432_v17 = vrot.slane %v337_v55, 4  ;;  %v260_v40 = vsel %vm1659_vm3, %v248_v34, 0.0 }
  0xb5   :  { %v1573_v20 = vpop.permute.xlu1 %356 }
  0xb6   :  { %v453_v53 = vsel %vm2464_vm12, %v301_v60, %v432_v17 }
  0xb7   :  { %v1590_v29 = vpop.permute.xlu0 %1313 }
  0xb8   :  { %v1316_v15 = vunpack.i.h.bf16 %v1590_v29  ;;  %v1315_v0 = vunpack.i.l.bf16 %v1590_v29  ;;  %v1709_v29 = vsel %vm2463_vm0, %v1291_v59, %v1325_v47  ;;  %v250_v59 = vsel %vm2460_vm11, %v1296_v27, %v1300_v30  ;;  %vm1752_vm11 = vmand %vm62_vm9, %vm1659_vm3 }
  0xb9   :  { %v262_v60 = vsel %vm1665_vm8, %v250_v59, 0.0  ;;  %vm60_vm0 = vcmp.ge.s32.totalorder %v1636_v42, 1 }
  0xba   :  { %v325_v27 = vsel %vm2462_vm7, %v1315_v0, %v1316_v15  ;;  %v324_v30 = vsel %vm2462_vm7, %v1316_v15, %v1310_v19  ;;  %v326_v38 = vsel %vm2462_vm7, %v1311_v18, %v1315_v0  ;;  %v226_v19 = vsel %vm1645_vm2, %v1709_v29, 0.0  ;;  %vm1773_vm7 = vmand %vm64_vm13, %vm1665_vm8 }
  0xbb   :  { %v335_v14 = vsel %vm61_vm5, %v325_v27, 0.0  ;;  %v336_v15 = vsel %vm62_vm9, %v324_v30, 0.0  ;;  %v338_v29 = vsel %vm64_vm13, %v326_v38, 0.0  ;;  %v421_v59 = vrot.slane %v262_v60, 4 }
  0xbc   :  { %v431_v11 = vrot.slane %v336_v15, 4  ;;  %v407_v27 = vld.sshfl [vmem:[#allocation1 + $0x8] sm:$0xff pattern:$0x75316420]  ;;  %v433_v37 = vrot.slane %v338_v29, 4  ;;  %v398_v9 = vrot.slane %v226_v19, 4 }
  0xbd   :  { %v351_v58 = vpop.permute.xlu1 %350  ;;  %v406_v38 = vld.sshfl [vmem:[#allocation1] sm:$0xff pattern:$0x75316420] }
  0xbe   :  { %v362_v32 = vsel %vm358_vm1, %v1573_v20, %v351_v58 }
  0xbf   :  { %v355_v16 = vpop.permute.xlu0 %354  ;;  %v378_v31 = vsel %vm1773_vm7, %v362_v32, 0.0 }
  0xc0   :  { %v359_v21 = vsel %vm358_vm1, %v355_v16, %v1573_v20 }
  0xc1   :  { %v377_v61 = vsel %vm1674_vm6, %v359_v21, 0.0  ;;  %vm1734_vm6 = vmand %vm61_vm5, %vm1680_vm14  ;;  %vm2499_vm5 = vcmask 1043456  }
  0xc2   :  { %1162 = vmatpush.msk.msra.mxu3 %vm2464_vm12, %v377_v61  ;;  %vm1804_vm12 = vmand %vm62_vm9, %vm1641_vm15  ;;  %v419_v61 = vrot.slane %v260_v40, 4  ;;  %v409_v40 = vld.sshfl [vmem:[#allocation1 + $0x18] sm:$0xff pattern:$0x75316420] }
  0xc3   :  { %vm1819_vm9 = vmand %vm64_vm13, %vm1645_vm2 }
  0xc4   :  { %523 = vmatpush.msra.mxu3 %v453_v53  ;;  %v430_v53 = vrot.slane %v335_v14, 4 }
  0xc5   :  { %v353_v55 = vpop.permute.xlu1 %352 }
  0xc6   :  { %524 = vmatpush.msra.mxu3 %v449_v3  ;;  %v361_v4 = vsel %vm358_vm1, %v351_v58, %v353_v55  ;;  %v360_v8 = vsel %vm358_vm1, %v353_v55, %v355_v16  ;;  %vm57_vm1 = vcmp.ge.s32.totalorder %v1652_v56, 1 }
  0xc7   :  { %v1319_v0 = vpop.permute.xlu0 %1318  ;;  %v375_v16 = vsel %vm1734_vm6, %v361_v4, 0.0  ;;  %v376_v17 = vsel %vm1752_vm11, %v360_v8, 0.0  ;;  %vm2500_vm11 = vmmov %vm2499_vm5  ;;  %vm2503_vm6 = vcmp.lt.s32.totalorder %v1506_v52, 1  ;;  %v396_v8 = vrot.slane %v224_v36, 4 }
  0xc8   :  { %v1321_v33 = vunpack.i.h.bf16 %v1319_v0  ;;  %v1320_v34 = vunpack.i.l.bf16 %v1319_v0  ;;  %1158 = vmatpush.msk.msra.mxu0 %vm2499_vm5, %v375_v16  ;;  %1160 = vmatpush.msk.msra.mxu1 %vm2500_vm11, %v376_v17  ;;  %v214_v20 = vsel %vm2503_vm6, %v1325_v47, %v1326_v43  ;;  %vm2504_vm5 = vcmp.lt.s32.totalorder %v1506_v52, 113  ;;  %vm1857_vm7 = vmand %vm57_vm1, %vm1680_vm14 }
  0xc9   :  { %525 = vmatpush.msra.mxu3 %v445_v26  ;;  %vm2505_vm13 = vmmov %vm2504_vm5  ;;  %vm2507_vm6 = vcmask 1043456   ;;  %v223_v3 = vsel %vm1738_vm4, %v214_v20, 0.0  ;;  %vm455_vm14 = vcmask 293888  }
  0xca   :  { %v285_v58 = vsel %vm2504_vm5, %v1320_v34, %v1321_v33  ;;  %v284_v26 = vsel %vm2505_vm13, %v1321_v33, %v1305_v23  ;;  %vm2506_vm11 = vmmov %vm2504_vm5  ;;  %v395_v0 = vrot.slane %v223_v3, 4 }
  0xcb   :  { %v286_v30 = vsel %vm2506_vm11, %v1306_v22, %v1320_v34  ;;  %526 = vmatpush.msra.mxu3 %v1655_v57  ;;  %v299_v43 = vsel %vm1787_vm10, %v285_v58, 0.0  ;;  %v300_v47 = vsel %vm1804_vm12, %v284_v26, 0.0  ;;  %vm2508_vm5 = vmmov %vm2507_vm6 }
  0xcc   :  { %v302_v23 = vsel %vm1819_vm9, %v286_v30, 0.0  ;;  %v451_v1 = vsel %vm2508_vm5, %v299_v43, %v430_v53  ;;  %vm2509_vm13 = vmmov %vm2508_vm5  ;;  %vm2515_vm9 = vcmp.ge.s32.totalorder %v1557_v13, 1 }
  0xcd   :  { %1164 = vmatpush.msk.msrb.mxu3 %vm2507_vm6, %v378_v31  ;;  %v452_v22 = vsel %vm2509_vm13, %v300_v47, %v431_v11  ;;  %vm2510_vm11 = vmmov %vm2508_vm5  ;;  %483 = vmatpush.msra.mxu0 %v451_v1  ;;  %v1334_v18 = vpop.permute.xlu1 %1333 }
  0xce   :  { %v454_v57 = vsel %vm2510_vm11, %v302_v23, %v433_v37  ;;  %503 = vmatpush.msra.mxu1 %v452_v22  ;;  %vm2513_vm10 = vmmov %vm2508_vm5  ;;  %v1336_v14 = vunpack.i.h.bf16 %v1334_v18  ;;  %v1335_v15 = vunpack.i.l.bf16 %v1334_v18 }
  0xcf   :  { %v447_v60 = vsel %vm2513_vm10, %v406_v38, %v418_v39  ;;  %vm2514_vm12 = vmmov %vm2508_vm5  ;;  %543 = vmatpush.msrb.mxu3 %v454_v57  ;;  %v37_v39 = vld [vmem:[%s2447_s1] sm:$0xff]  ;;  %v1329_v36 = vpop.permute.xlu0 %1328 }
  0xd0   :  { %v448_v4 = vsel %vm2514_vm12, %v407_v27, %v419_v61  ;;  %vm1869_vm6 = vmand %vm2515_vm9, %vm1659_vm3  ;;  %vm2518_vm3 = vcmp.lt.s32.totalorder %v1506_v52, 17  ;;  %484 = vmatpush.msra.mxu0 %v447_v60  ;;  %v1331_v17 = vunpack.i.h.bf16 %v1329_v36  ;;  %v1330_v21 = vunpack.i.l.bf16 %v1329_v36  ;;  %1163 = vmatmul.msk.f32.vlgmr.msra.gmra.mxu3 %vm455_vm14, %v37_v39  ;;  %v38_v36 = vld [vmem:[%s2448_s2] sm:$0xff]  ;;  %s1378_s2 = smov 121  }
  0xd1   :  { %v98_v2 = vsel %vm2518_vm3, %v1340_v44, %v1341_v41  ;;  %vm1890_vm5 = vmand %vm57_vm1, %vm1738_vm4  ;;  %504 = vmatpush.msra.mxu1 %v448_v4  ;;  %v1376_v4 = vmov 0  }
  0xd2   :  { %vm2521_vm13 = vmmov %vm2513_vm10  ;;  %v111_v35 = vsel %vm1890_vm5, %v98_v2, 0.0  ;;  %1342 = vset.pattern.permute.xlu2 %v1376_v4  ;;  %1363 = vset.pattern.permute.xlu0 %v1376_v4 }
  0xd3   :  { %v450_v19 = vsel %vm2521_vm13, %v409_v40, %v421_v59  ;;  %vm1899_vm11 = vmand %vm60_vm0, %vm1665_vm8  ;;  %vm2526_vm8 = vcmp.lt.s32.totalorder %v1506_v52, 15 }
  0xd4   :  { %vm2524_vm4 = vmmov %vm2518_vm3  ;;  %544 = vmatpush.msrb.mxu3 %v450_v19  ;;  %v174_v29 = vsel %vm2526_vm8, %v1335_v15, %v1336_v14 }
  0xd5   :  { %v97_v28 = vsel %vm2524_vm4, %v1341_v41, %v1275_v6  ;;  %vm2525_vm10 = vmmov %vm2518_vm3  ;;  %v187_v6 = vsel %vm1857_vm7, %v174_v29, 0.0  ;;  %vm2531_vm7 = vcmp.lt.s32.totalorder %v1506_v52, 16 }
  0xd6   :  { %v95_v7 = vsel %vm2525_vm10, %v1276_v5, %v1340_v44  ;;  %vm2527_vm12 = vmmov %vm2526_vm8  ;;  %v138_v32 = vsel %vm2531_vm7, %v1330_v21, %v1331_v17 }
  0xd7   :  { %v173_v61 = vsel %vm2527_vm12, %v1336_v14, %v1285_v25  ;;  %vm2528_vm9 = vmmov %vm2526_vm8  ;;  %v147_v33 = vsel %vm57_vm1, %v138_v32, 0.0 }
  0xd8   :  { %v188_v48 = vsel %vm1869_vm6, %v173_v61, 0.0  ;;  %v171_v5 = vsel %vm2528_vm9, %v1286_v24, %v1335_v15  ;;  %vm2529_vm3 = vmmov %vm2521_vm13  ;;  %vm2532_vm6 = vcmp.ge.s32.totalorder %v1557_v13, 1  ;;  %v383_v49 = vrot.slane %v147_v33, 4 }
  0xd9   :  { %v443_v41 = vsel %vm2529_vm3, %v187_v6, %v395_v0  ;;  %vm2530_vm13 = vmmov %vm2529_vm3  ;;  %v190_v44 = vsel %vm1899_vm11, %v171_v5, 0.0 }
  0xda   :  { %v444_v25 = vsel %vm2530_vm13, %v188_v48, %v396_v8  ;;  %vm1942_vm4 = vmand %vm2532_vm6, %vm1641_vm15  ;;  %485 = vmatpush.msra.mxu0 %v443_v41 }
  0xdb   :  { %505 = vmatpush.msra.mxu1 %v444_v25  ;;  %vm2535_vm5 = vmmov %vm2529_vm3  ;;  %v112_v11 = vsel %vm1942_vm4, %v97_v28, 0.0  ;;  %v39_v28 = vld [vmem:[%s2449_s3] sm:$0xff]  ;;  %s1379_s3 = smov 120  }
  0xdc   :  { %v446_v24 = vsel %vm2535_vm5, %v190_v44, %v398_v9  ;;  %vm2536_vm11 = vmmov %vm2531_vm7 }
  0xdd   :  { %v137_v34 = vsel %vm2536_vm11, %v1331_v17, %v1280_v63  ;;  %vm102_vm15 = vmand %vm60_vm0, %vm1645_vm2  ;;  %545 = vmatpush.msrb.mxu3 %v446_v24 }
  0xde   :  { %vm2537_vm10 = vmmov %vm2531_vm7  ;;  %v114_v27 = vsel %vm102_vm15, %v95_v7, 0.0 }
  0xdf   :  { %v135_v45 = vsel %vm2537_vm10, %v1281_v62, %v1330_v21  ;;  %vm2538_vm8 = vmmov %vm2532_vm6 }
  0xe0   :  { %v148_v56 = vsel %vm2538_vm8, %v137_v34, 0.0  ;;  %v150_v59 = vsel %vm60_vm0, %v135_v45, 0.0  ;;  %vm2539_vm1 = vmmov %vm2529_vm3 }
  0xe1   :  { %v384_v53 = vrot.slane %v148_v56, 4  ;;  %v386_v63 = vrot.slane %v150_v59, 4  ;;  %v439_v46 = vsel %vm2539_vm1, %v111_v35, %v383_v49  ;;  %vm2540_vm2 = vmmov %vm2539_vm1  ;;  %v645_v59 = vshra.s32 %v1506_v52, 6 }
  0xe2   :  { %486 = vmatpush.msra.mxu0 %v439_v46  ;;  %vm2541_vm12 = vmmov %vm2539_vm1 }
  0xe3   :  { %v440_v54 = vsel %vm2540_vm2, %v112_v11, %v384_v53  ;;  %v442_v62 = vsel %vm2541_vm12, %v114_v27, %v386_v63  ;;  %1159 = vmatmul.msk.f32.vlgmr.msra.gmra.mxu0 %vm455_vm14, %v37_v39  ;;  %v646_v53 = vshra.s32 %v1506_v52, 3  ;;  %v1996_v63 = vshrl.u32 %v40_v50, 7 }
  0xe4   :  { %506 = vmatpush.msra.mxu1 %v440_v54  ;;  %546 = vmatpush.msrb.mxu3 %v442_v62  ;;  %v2001_v11 = vand.u32 7, %v1506_v52  ;;  %v649_v27 = vmul.u32 256, %v645_v59 }
  0xe5   :  { %1161 = vmatmul.msk.f32.vlgmr.msra.gmra.mxu1 %vm455_vm14, %v37_v39  ;;  %1165 = vmatmul.msk.f32.vlgmr.msrb.gmra.mxu3 %vm455_vm14, %v37_v39  ;;  %v1998_v46 = vand.u32 7, %v646_v53  ;;  %v703_v62 = vadd.s32 376, %v1996_v63  ;;  %v2009_v50 = vadd.s32 352, %v1996_v63  ;;  %v2043_v4 = vadd.s32 224, %v1996_v63 }
  0xe6   :  { %v2192_v59 = vadd.s32 56, %v1996_v63  ;;  %v679_v53 = vadd.s32 184, %v1996_v63 }
  0xe7   :  { %v650_v54 = vmul.u32 2, %v1998_v46 }
 0x153   :  { %v528_v13 = vpop.f32.mrf.mxu3 }
 0x160   :  { %v488_v42 = vpop.f32.mrf.mxu0 }
 0x162   :  { %v508_v20 = vpop.f32.mrf.mxu1 }
 0x163   :  { %v551_v58 = vadd.f32 %v508_v20, %v488_v42 }
 0x165   :  { %v552_v26 = vadd.f32 %v551_v58, %v528_v13  ;;  %v701_v58 = vadd.s32 360, %v1996_v63 }
 0x168   :  { %v548_v30 = vpop.f32.mrf.mxu3 }
 0x169   :  { %v553_v37 = vadd.f32 %v552_v26, %v548_v30  ;;  %v2012_v26 = vadd.s32 120, %v1996_v63 }
 0x16b   :  { %554 = vadd.xlane.f32.xlu0 %v553_v37 }
 0x1de   :  { %v555_v38 = vpop.xlane.xlu0 %554 }
 0x1df   :  { %v556_v31 = vmul.f32 0.001953125, %v555_v38 }
 0x1e1   :  { %v557_v43 = vsub.f32 %v488_v42, %v556_v31  ;;  %v558_v47 = vsub.f32 %v508_v20, %v556_v31  ;;  %v559_v23 = vsub.f32 %v528_v13, %v556_v31  ;;  %v560_v1 = vsub.f32 %v548_v30, %v556_v31 }
 0x1e2   :  { %v651_v13 = vmul.u32 16, %v650_v54  ;;  %v653_v42 = vmul.u32 2, %v2001_v11  ;;  %v702_v20 = vadd.s32 368, %v1996_v63  ;;  %v687_v30 = vadd.s32 248, %v1996_v63 }
 0x1e3   :  { %v561_v22 = vmul.f32 %v557_v43, %v557_v43  ;;  %v562_v57 = vmul.f32 %v558_v47, %v558_v47  ;;  %v563_v40 = vmul.f32 %v559_v23, %v559_v23  ;;  %v564_v3 = vmul.f32 %v560_v1, %v560_v1 }
 0x1e4   :  { %v652_v38 = vadd.s32 %v651_v13, %v649_v27  ;;  %v2018_v31 = vadd.s32 344, %v1996_v63  ;;  %v692_v27 = vadd.s32 288, %v1996_v63  ;;  %v2249_v13 = vadd.s32 48, %v1996_v63 }
 0x1e5   :  { %v565_v55 = vadd.f32 %v562_v57, %v561_v22  ;;  %v718_v22 = vadd.s32 496, %v1996_v63  ;;  %v2030_v57 = vadd.s32 104, %v1996_v63 }
 0x1e7   :  { %v566_v18 = vadd.f32 %v565_v55, %v563_v40  ;;  %v2032_v40 = vadd.s32 %v653_v42, %v652_v38  ;;  %v685_v55 = vadd.s32 232, %v1996_v63  ;;  %v678_v42 = vadd.s32 176, %v1996_v63 }
 0x1e8   :  { %v709_v38 = vadd.s32 424, %v1996_v63 }
 0x1e9   :  { %v567_v60 = vadd.f32 %v566_v18, %v564_v3  ;;  %v2036_v3 = vadd.s32 328, %v1996_v63  ;;  %v717_v18 = vadd.s32 488, %v1996_v63  ;;  %vm767_vm4 = vcmp.eq.s32.totalorder %v703_v62, %v2032_v40 }
 0x1ea   :  { %vm766_vm5 = vcmp.eq.s32.totalorder %v702_v20, %v2032_v40  ;;  %vm735_vm11 = vcmp.eq.s32.totalorder %v2012_v26, %v2032_v40  ;;  %vm751_vm15 = vcmp.eq.s32.totalorder %v687_v30, %v2032_v40  ;;  %vm765_vm8 = vcmp.eq.s32.totalorder %v701_v58, %v2032_v40 }
 0x1eb   :  { %568 = vadd.xlane.f32.xlu1 %v567_v60  ;;  %v2040_v60 = vadd.s32 96, %v1996_v63  ;;  %vm782_vm12 = vcmp.eq.s32.totalorder %v718_v22, %v2032_v40  ;;  %v691_v62 = vadd.s32 280, %v1996_v63  ;;  %v690_v20 = vadd.s32 272, %v1996_v63 }
 0x1ec   :  { %v710_v58 = vadd.s32 432, %v1996_v63  ;;  %v677_v30 = vadd.s32 168, %v1996_v63  ;;  %v2287_v22 = vadd.s32 24, %v1996_v63 }
 0x25e   :  { %v569_v10 = vpop.xlane.xlu1 %568 }
 0x25f   :  { %v570_v8 = vmul.f32 0.001953125, %v569_v10  ;;  %v2046_v10 = vadd.s32 320, %v1996_v63 }
 0x261   :  { %v571_v9 = vadd.f32 1e-05, %v570_v8  ;;  %v716_v8 = vadd.s32 480, %v1996_v63 }
 0x263   :  { %1364 = vrsqrt.f32 %v571_v9  ;;  %vm578_vm14 = vweird.f32 %v571_v9 }
 0x269   :  { %v1365_v14 = vpop.eup %1364 }
 0x26a   :  { %v573_v15 = vmul.f32 %v1365_v14, %v571_v9  ;;  %vm579_vm0 = vweird.f32 %v1365_v14  ;;  %v2052_v9 = vadd.s32 88, %v1996_v63 }
 0x26b   :  { %vm580_vm9 = vmor %vm578_vm14, %vm579_vm0  ;;  %vm733_vm0 = vcmp.eq.s32.totalorder %v2030_v57, %v2032_v40  ;;  %vm749_vm14 = vcmp.eq.s32.totalorder %v685_v55, %v2032_v40  ;;  %v675_v55 = vadd.s32 152, %v1996_v63 }
 0x26c   :  { %v574_v39 = vmul.f32 %v1365_v14, %v573_v15  ;;  %v1377_v15 = vmov 1.0  }
 0x26d   :  { %1198 = vmatpush.msk.msra.mxu2 %vm767_vm4, %v1377_v15  ;;  %1166 = vmatpush.msk.msrb.mxu0 %vm735_vm11, %v1377_v15  ;;  %vm780_vm11 = vcmp.eq.s32.totalorder %v716_v8, %v2032_v40  ;;  %v2314_v8 = vadd.s32 8, %v1996_v63 }
 0x26e   :  { %v575_v2 = vmul.f32 0.5, %v574_v39  ;;  %v2063_v39 = vadd.s32 312, %v1996_v63  ;;  %1182 = vmatpush.msk.msrb.mxu1 %vm751_vm15, %v1377_v15 }
 0x26f   :  { %1199 = vmatpush.msk.msra.mxu2 %vm766_vm5, %v1377_v15  ;;  %vm748_vm5 = vcmp.eq.s32.totalorder %v2043_v4, %v2032_v40  ;;  %v674_v4 = vadd.s32 144, %v1996_v63 }
 0x270   :  { %v576_v12 = vsub.f32 1.5, %v575_v2  ;;  %v2072_v2 = vadd.s32 472, %v1996_v63 }
 0x271   :  { %1200 = vmatpush.msk.msra.mxu2 %vm765_vm8, %v1377_v15  ;;  %vm761_vm8 = vcmp.eq.s32.totalorder %v2036_v3, %v2032_v40  ;;  %v707_v3 = vadd.s32 408, %v1996_v63 }
 0x272   :  { %v577_v19 = vmul.f32 %v1365_v14, %v576_v12  ;;  %v2081_v12 = vadd.s32 80, %v1996_v63 }
 0x274   :  { %v581_v0 = vsel %vm580_vm9, %v1365_v14, %v577_v19  ;;  %v2055_v14 = vadd.s32 216, %v1996_v63  ;;  %vm764_vm9 = vcmp.eq.s32.totalorder %v2009_v50, %v2032_v40  ;;  %v2262_v50 = vadd.s32 40, %v1996_v63 }
 0x275   :  { %v582_v16 = vmul.f32 %v581_v0, %v38_v36  ;;  %1201 = vmatpush.msk.msra.mxu2 %vm764_vm9, %v1377_v15 }
 0x277   :  { %585 = vperm.xlu2 %1342, %v582_v16   ;;  %v682_v16 = vadd.s32 208, %v1996_v63 }
 0x279   :  { %vm746_vm9 = vcmp.eq.s32.totalorder %v682_v16, %v2032_v40 }
 0x27f   :  { %594 = vperm.xlu2 %1342, %v39_v28  }
 0x2d1   :  { %v586_v7 = vpop.permute.xlu2 %585 }
 0x2d2   :  { %v588_v17 = vmul.f32 %v586_v7, %v557_v43  ;;  %v590_v21 = vmul.f32 %v586_v7, %v559_v23  ;;  %v589_v29 = vmul.f32 %v586_v7, %v558_v47  ;;  %v591_v61 = vmul.f32 %v586_v7, %v560_v1 }
 0x2d3   :  { %v719_v43 = vadd.s32 504, %v1996_v63  ;;  %v2022_v47 = vadd.s32 112, %v1996_v63  ;;  %v686_v23 = vadd.s32 240, %v1996_v63  ;;  %v2026_v1 = vadd.s32 336, %v1996_v63 }
 0x2d4   :  { %v2096_v7 = vadd.s32 304, %v1996_v63 }
 0x2d5   :  { %vm783_vm10 = vcmp.eq.s32.totalorder %v719_v43, %v2032_v40  ;;  %vm734_vm1 = vcmp.eq.s32.totalorder %v2022_v47, %v2032_v40  ;;  %vm750_vm2 = vcmp.eq.s32.totalorder %v686_v23, %v2032_v40  ;;  %vm762_vm15 = vcmp.eq.s32.totalorder %v2026_v1, %v2032_v40 }
 0x2d6   :  { %1214 = vmatpush.msk.msra.mxu3 %vm783_vm10, %v1377_v15  ;;  %1167 = vmatpush.msk.msrb.mxu0 %vm734_vm1, %v1377_v15  ;;  %vm731_vm10 = vcmp.eq.s32.totalorder %v2052_v9, %v2032_v40  ;;  %vm747_vm1 = vcmp.eq.s32.totalorder %v2055_v14, %v2032_v40  ;;  %v676_v43 = vadd.s32 160, %v1996_v63  ;;  %v688_v23 = vadd.s32 256, %v1996_v63 }
 0x2d7   :  { %1183 = vmatpush.msk.msrb.mxu1 %vm750_vm2, %v1377_v15  ;;  %v708_v1 = vadd.s32 416, %v1996_v63  ;;  %v673_v14 = vadd.s32 136, %v1996_v63 }
 0x2d8   :  { %1215 = vmatpush.msk.msra.mxu3 %vm782_vm12, %v1377_v15  ;;  %1168 = vmatpush.msk.msrb.mxu0 %vm733_vm0, %v1377_v15  ;;  %vm779_vm12 = vcmp.eq.s32.totalorder %v2072_v2, %v2032_v40  ;;  %v672_v2 = vadd.s32 128, %v1996_v63 }
 0x2d9   :  { %v595_v6 = vpop.permute.xlu2 %594  ;;  %1184 = vmatpush.msk.msrb.mxu1 %vm749_vm14, %v1377_v15  ;;  %vm730_vm14 = vcmp.eq.s32.totalorder %v2081_v12, %v2032_v40 }
 0x2da   :  { %v597_v48 = vadd.f32 %v595_v6, %v588_v17  ;;  %v599_v5 = vadd.f32 %v595_v6, %v590_v21  ;;  %v598_v35 = vadd.f32 %v595_v6, %v589_v29  ;;  %v600_v41 = vadd.f32 %v595_v6, %v591_v61 }
 0x2db   :  { %v714_v17 = vadd.s32 464, %v1996_v63  ;;  %v2111_v29 = vadd.s32 72, %v1996_v63  ;;  %1185 = vmatpush.msk.msrb.mxu1 %vm748_vm5, %v1377_v15 }
 0x2dc   :  { %vm601_vm3 = vcmp.gt.f32.partialorder %v597_v48, 0.0  ;;  %vm603_vm13 = vcmp.gt.f32.partialorder %v599_v5, 0.0  ;;  %v605_v25 = vmul.f32 0.01, %v597_v48  ;;  %v607_v44 = vmul.f32 0.01, %v599_v5 }
 0x2dd   :  { %v606_v33 = vmul.f32 0.01, %v598_v35  ;;  %v608_v34 = vmul.f32 0.01, %v600_v41  ;;  %vm602_vm7 = vcmp.gt.f32.partialorder %v598_v35, 0.0  ;;  %vm604_vm6 = vcmp.gt.f32.partialorder %v600_v41, 0.0  ;;  %1186 = vmatpush.msk.msrb.mxu1 %vm747_vm1, %v1377_v15 }
 0x2de   :  { %v1979_v32 = vsel %vm601_vm3, %v597_v48, %v605_v25  ;;  %v1981_v51 = vsel %vm603_vm13, %v599_v5, %v607_v44  ;;  %vm781_vm3 = vcmp.eq.s32.totalorder %v717_v18, %v2032_v40  ;;  %vm763_vm13 = vcmp.eq.s32.totalorder %v2018_v31, %v2032_v40 }
 0x2df   :  { %v1343_v24 = vpack.i.bf16 %v1981_v51, %v1979_v32  ;;  %v1986_v45 = vsel %vm602_vm7, %v598_v35, %v606_v33  ;;  %v1988_v49 = vsel %vm604_vm6, %v600_v41, %v608_v34  ;;  %vm732_vm7 = vcmp.eq.s32.totalorder %v2040_v60, %v2032_v40  ;;  %1216 = vmatpush.msk.msra.mxu3 %vm781_vm3, %v1377_v15 }
 0x2e0   :  { %v1348_v56 = vpack.i.bf16 %v1986_v45, %v1988_v49  ;;  %vm2542_vm6 = vcmp.lt.s32.totalorder %v1506_v52, 127  ;;  %1202 = vmatpush.msk.msra.mxu2 %vm763_vm13, %v1377_v15  ;;  %1169 = vmatpush.msk.msrb.mxu0 %vm732_vm7, %v1377_v15  ;;  %v681_v35 = vadd.s32 200, %v1996_v63  ;;  %v713_v41 = vadd.s32 456, %v1996_v63 }
 0x2e1   :  { %1344 = vrot.lane.b32.xlu2 %v1343_v24, %s1372_s20  ;;  %vm2543_vm4 = vmmov %vm2542_vm6  ;;  %1217 = vmatpush.msk.msra.mxu3 %vm780_vm11, %v1377_v15  ;;  %v680_v33 = vadd.s32 192, %v1996_v63  ;;  %vm760_vm3 = vcmp.eq.s32.totalorder %v2046_v10, %v2032_v40  ;;  %vm778_vm13 = vcmp.eq.s32.totalorder %v714_v17, %v2032_v40  ;;  %v693_v34 = vadd.s32 296, %v1996_v63 }
 0x2e2   :  { %vm2544_vm2 = vmmov %vm2543_vm4  ;;  %1203 = vmatpush.msk.msra.mxu2 %vm762_vm15, %v1377_v15  ;;  %1170 = vmatpush.msk.msrb.mxu0 %vm731_vm10, %v1377_v15  ;;  %vm729_vm7 = vcmp.eq.s32.totalorder %v2111_v29, %v2032_v40  ;;  %vm777_vm5 = vcmp.eq.s32.totalorder %v713_v41, %v2032_v40  ;;  %vm758_vm10 = vcmp.eq.s32.totalorder %v2096_v7, %v2032_v40  ;;  %v2270_v31 = vadd.s32 32, %v1996_v63 }
 0x2e3   :  { %vm2545_vm0 = vmmov %vm2544_vm2  ;;  %1218 = vmatpush.msk.msra.mxu3 %vm779_vm12, %v1377_v15  ;;  %1187 = vmatpush.msk.msrb.mxu1 %vm746_vm9, %v1377_v15  ;;  %vm744_vm15 = vcmp.eq.s32.totalorder %v680_v33, %v2032_v40  ;;  %vm727_vm1 = vcmp.eq.s32.totalorder %v2192_v59, %v2032_v40  ;;  %vm743_vm12 = vcmp.eq.s32.totalorder %v679_v53, %v2032_v40  ;;  %v2299_v18 = vadd.s32 16, %v1996_v63 }
 0x2e4   :  { %1204 = vmatpush.msk.msra.mxu2 %vm761_vm8, %v1377_v15  ;;  %1171 = vmatpush.msk.msrb.mxu0 %vm730_vm14, %v1377_v15  ;;  %vm756_vm14 = vcmp.eq.s32.totalorder %v692_v27, %v2032_v40  ;;  %vm755_vm9 = vcmp.eq.s32.totalorder %v691_v62, %v2032_v40  ;;  %v706_v10 = vadd.s32 400, %v1996_v63 }
 0x2e5   :  { %1219 = vmatpush.msk.msra.mxu3 %vm778_vm13, %v1377_v15  ;;  %vm742_vm13 = vcmp.eq.s32.totalorder %v678_v42, %v2032_v40 }
 0x2e6   :  { %1205 = vmatpush.msk.msra.mxu2 %vm760_vm3, %v1377_v15  ;;  %1172 = vmatpush.msk.msrb.mxu0 %vm729_vm7, %v1377_v15  ;;  %vm726_vm3 = vcmp.eq.s32.totalorder %v2249_v13, %v2032_v40  ;;  %vm754_vm7 = vcmp.eq.s32.totalorder %v690_v20, %v2032_v40  ;;  %v928_v20 = vld [vmem:[%s2450_s4] sm:$0xff] }
 0x2e7   :  { %1220 = vmatpush.msk.msra.mxu3 %vm777_vm5, %v1377_v15  ;;  %vm741_vm5 = vcmp.eq.s32.totalorder %v677_v30, %v2032_v40  ;;  %v1127_v30 = vld [vmem:[%s2451_s9] sm:$0xff] }
 0x2e9   :  { %1349 = vrot.lane.b32.xlu2 %v1348_v56, %s1372_s20 }
 0x33b   :  { %v2015_v37 = vpop.permute.xlu2 %1344 }
 0x33c   :  { %v1347_v36 = vunpack.i.h.bf16 %v2015_v37  ;;  %v1346_v19 = vunpack.i.l.bf16 %v2015_v37  ;;  %v689_v37 = vadd.s32 264, %v1996_v63 }
 0x343   :  { %v1350_v0 = vpop.permute.xlu2 %1349 }
 0x344   :  { %v1351_v28 = vunpack.i.l.bf16 %v1350_v0  ;;  %v1352_v21 = vunpack.i.h.bf16 %v1350_v0 }
 0x346   :  { %v621_v61 = vsel %vm2542_vm6, %v1347_v36, %v1351_v28  ;;  %v624_v6 = vsel %vm2543_vm4, %v1351_v28, %v1346_v19  ;;  %v623_v25 = vsel %vm2544_vm2, %v1346_v19, %v1352_v21  ;;  %v622_v24 = vsel %vm2545_vm0, %v1352_v21, %v1347_v36 }
 0x347   :  { %v2125_v48 = vmax.f32 %v1981_v51, %v621_v61  ;;  %v2128_v5 = vmax.f32 %v1988_v49, %v624_v6  ;;  %v2154_v51 = vadd.s32 64, %v1996_v63  ;;  %v712_v49 = vadd.s32 448, %v1996_v63 }
 0x348   :  { %v2178_v56 = vmax.f32 %v1979_v32, %v623_v25  ;;  %vm745_vm6 = vcmp.eq.s32.totalorder %v681_v35, %v2032_v40  ;;  %v2195_v32 = vmax.f32 %v1986_v45, %v622_v24  ;;  %vm759_vm4 = vcmp.eq.s32.totalorder %v2063_v39, %v2032_v40 }
 0x349   :  { %v1353_v44 = vpack.i.bf16 %v2128_v5, %v2125_v48  ;;  %vm728_vm11 = vcmp.eq.s32.totalorder %v2154_v51, %v2032_v40  ;;  %v711_v45 = vadd.s32 440, %v1996_v63  ;;  %1188 = vmatpush.msk.msrb.mxu1 %vm745_vm6, %v1377_v15  ;;  %vm776_vm8 = vcmp.eq.s32.totalorder %v712_v49, %v2032_v40  ;;  %1206 = vmatpush.msk.msra.mxu2 %vm759_vm4, %v1377_v15 }
 0x34a   :  { %v1358_v54 = vpack.i.bf16 %v2195_v32, %v2178_v56  ;;  %vm757_vm2 = vcmp.eq.s32.totalorder %v693_v34, %v2032_v40  ;;  %1173 = vmatpush.msk.msrb.mxu0 %vm728_vm11, %v1377_v15  ;;  %1221 = vmatpush.msk.msra.mxu3 %vm776_vm8, %v1377_v15  ;;  %vm774_vm6 = vcmp.eq.s32.totalorder %v710_v58, %v2032_v40  ;;  %v705_v39 = vadd.s32 392, %v1996_v63 }
 0x34b   :  { %1354 = vrot.lane.b32.xlu2 %v1353_v44, %s1374_s22  ;;  %1189 = vmatpush.msk.msrb.mxu1 %vm744_vm15, %v1377_v15  ;;  %vm775_vm0 = vcmp.eq.s32.totalorder %v711_v45, %v2032_v40  ;;  %vm725_vm4 = vcmp.eq.s32.totalorder %v2262_v50, %v2032_v40  ;;  %vm753_vm11 = vcmp.eq.s32.totalorder %v689_v37, %v2032_v40  ;;  %v704_v36 = vadd.s32 384, %v1996_v63 }
 0x34c   :  { %1207 = vmatpush.msk.msra.mxu2 %vm758_vm10, %v1377_v15  ;;  %1174 = vmatpush.msk.msrb.mxu0 %vm727_vm1, %v1377_v15  ;;  %vm773_vm15 = vcmp.eq.s32.totalorder %v709_v38, %v2032_v40  ;;  %vm724_vm10 = vcmp.eq.s32.totalorder %v2270_v31, %v2032_v40  ;;  %vm740_vm8 = vcmp.eq.s32.totalorder %v676_v43, %v2032_v40 }
 0x34d   :  { %1190 = vmatpush.msk.msrb.mxu1 %vm743_vm12, %v1377_v15  ;;  %1222 = vmatpush.msk.msra.mxu3 %vm775_vm0, %v1377_v15  ;;  %vm752_vm1 = vcmp.eq.s32.totalorder %v688_v23, %v2032_v40  ;;  %vm723_vm12 = vcmp.eq.s32.totalorder %v2287_v22, %v2032_v40  ;;  %vm739_vm0 = vcmp.eq.s32.totalorder %v675_v55, %v2032_v40 }
 0x34e   :  { %1208 = vmatpush.msk.msra.mxu2 %vm757_vm2, %v1377_v15  ;;  %1175 = vmatpush.msk.msrb.mxu0 %vm726_vm3, %v1377_v15  ;;  %vm772_vm2 = vcmp.eq.s32.totalorder %v708_v1, %v2032_v40  ;;  %vm738_vm3 = vcmp.eq.s32.totalorder %v674_v4, %v2032_v40 }
 0x34f   :  { %1191 = vmatpush.msk.msrb.mxu1 %vm742_vm13, %v1377_v15  ;;  %1223 = vmatpush.msk.msra.mxu3 %vm774_vm6, %v1377_v15  ;;  %vm770_vm13 = vcmp.eq.s32.totalorder %v706_v10, %v2032_v40  ;;  %vm737_vm6 = vcmp.eq.s32.totalorder %v673_v14, %v2032_v40 }
 0x350   :  { %1209 = vmatpush.msk.msra.mxu2 %vm756_vm14, %v1377_v15  ;;  %1176 = vmatpush.msk.msrb.mxu0 %vm725_vm4, %v1377_v15  ;;  %vm771_vm14 = vcmp.eq.s32.totalorder %v707_v3, %v2032_v40  ;;  %vm769_vm4 = vcmp.eq.s32.totalorder %v705_v39, %v2032_v40 }
 0x351   :  { %1192 = vmatpush.msk.msrb.mxu1 %vm741_vm5, %v1377_v15  ;;  %1224 = vmatpush.msk.msra.mxu3 %vm773_vm15, %v1377_v15  ;;  %vm720_vm5 = vcmp.eq.s32.totalorder %v1996_v63, %v2032_v40  ;;  %vm768_vm15 = vcmp.eq.s32.totalorder %v704_v36, %v2032_v40 }
 0x352   :  { %1210 = vmatpush.msk.msra.mxu2 %vm755_vm9, %v1377_v15  ;;  %1177 = vmatpush.msk.msrb.mxu0 %vm724_vm10, %v1377_v15  ;;  %vm722_vm9 = vcmp.eq.s32.totalorder %v2299_v18, %v2032_v40  ;;  %vm2546_vm10 = vcmp.lt.s32.totalorder %v1506_v52, 112 }
 0x353   :  { %1359 = vrot.lane.b32.xlu2 %v1358_v54, %s1374_s22  ;;  %1193 = vmatpush.msk.msrb.mxu1 %vm740_vm8, %v1377_v15  ;;  %vm2547_vm8 = vmmov %vm2546_vm10 }
 0x354   :  { %1211 = vmatpush.msk.msra.mxu2 %vm754_vm7, %v1377_v15  ;;  %1225 = vmatpush.msk.msra.mxu3 %vm772_vm2, %v1377_v15  ;;  %vm721_vm7 = vcmp.eq.s32.totalorder %v2314_v8, %v2032_v40 }
 0x355   :  { %1178 = vmatpush.msk.msrb.mxu0 %vm723_vm12, %v1377_v15  ;;  %1194 = vmatpush.msk.msrb.mxu1 %vm739_vm0, %v1377_v15  ;;  %vm932_vm12 = vcmp.le.s32.totalorder %v1998_v46, 6  ;;  %vm934_vm0 = vcmp.le.s32.totalorder %v2001_v11, 6 }
 0x356   :  { %1212 = vmatpush.msk.msra.mxu2 %vm753_vm11, %v1377_v15  ;;  %1226 = vmatpush.msk.msra.mxu3 %vm771_vm14, %v1377_v15  ;;  %vm736_vm11 = vcmp.eq.s32.totalorder %v672_v2, %v2032_v40  ;;  %vm975_vm14 = vmand %vm932_vm12, %vm934_vm0  ;;  %v929_v2 = vld [vmem:[%s2452_s5] sm:$0xff] }
 0x357   :  { %1179 = vmatpush.msk.msrb.mxu0 %vm722_vm9, %v1377_v15  ;;  %1195 = vmatpush.msk.msrb.mxu1 %vm738_vm3, %v1377_v15  ;;  %vm933_vm9 = vcmp.ge.s32.totalorder %v2001_v11, 1 }
 0x358   :  { %1213 = vmatpush.msk.msra.mxu2 %vm752_vm1, %v1377_v15  ;;  %1227 = vmatpush.msk.msra.mxu3 %vm770_vm13, %v1377_v15  ;;  %vm2548_vm1 = vmmov %vm2547_vm8  ;;  %vm931_vm13 = vcmp.ge.s32.totalorder %v1998_v46, 1 }
 0x359   :  { %1180 = vmatpush.msk.msrb.mxu0 %vm721_vm7, %v1377_v15  ;;  %1196 = vmatpush.msk.msrb.mxu1 %vm737_vm6, %v1377_v15  ;;  %vm2549_vm2 = vmmov %vm2548_vm1 }
 0x35a   :  { %1228 = vmatpush.msk.msra.mxu3 %vm769_vm4, %v1377_v15  ;;  %vm964_vm3 = vmand %vm932_vm12, %vm933_vm9  ;;  %vm979_vm4 = vcmask 588800  }
 0x35b   :  { %1181 = vmatpush.msk.msrb.mxu0 %vm720_vm5, %v1377_v15  ;;  %1197 = vmatpush.msk.msrb.mxu1 %vm736_vm11, %v1377_v15  ;;  %vm948_vm7 = vmand %vm931_vm13, %vm934_vm0 }
 0x35c   :  { %1229 = vmatpush.msk.msra.mxu3 %vm768_vm15, %v1377_v15  ;;  %vm937_vm6 = vmand %vm931_vm13, %vm933_vm9 }
 0x3a5   :  { %v1355_v19 = vpop.permute.xlu2 %1354 }
 0x3a6   :  { %v1357_v0 = vunpack.i.h.bf16 %v1355_v19  ;;  %v1356_v16 = vunpack.i.l.bf16 %v1355_v19 }
 0x3a8   :  { %v637_v28 = vsel %vm2546_vm10, %v1356_v16, %v1357_v0 }
 0x3a9   :  { %v643_v7 = vmax.f32 %v2125_v48, %v637_v28 }
 0x3ab   :  { %904 = vmatmul.f32.vlgmr.msra.gmra.mxu2 %v643_v7 }
 0x3ad   :  { %v1360_v17 = vpop.permute.xlu2 %1359 }
 0x3ae   :  { %v1362_v21 = vunpack.i.h.bf16 %v1360_v17  ;;  %v1361_v40 = vunpack.i.l.bf16 %v1360_v17 }
 0x3b0   :  { %v640_v61 = vsel %vm2547_vm8, %v1357_v0, %v1361_v40  ;;  %v639_v6 = vsel %vm2548_vm1, %v1361_v40, %v1362_v21  ;;  %v638_v35 = vsel %vm2549_vm2, %v1362_v21, %v1356_v16  ;;  %v930_v16 = vld [vmem:[%s2453_s6] sm:$0xff] }
 0x3b1   :  { %v644_v41 = vmax.f32 %v2128_v5, %v640_v61  ;;  %v641_v25 = vmax.f32 %v2178_v56, %v639_v6  ;;  %v642_v44 = vmax.f32 %v2195_v32, %v638_v35 }
 0x3b3   :  { %864 = vmatmul.f32.vlgmr.msrb.gmra.mxu0 %v641_v25  ;;  %884 = vmatmul.f32.vlgmr.msrb.gmra.mxu1 %v642_v44  ;;  %v1093_v25 = vshra.s32 %v2022_v47, 6  ;;  %v1092_v44 = vshra.s32 %v2030_v57, 6  ;;  %v1088_v47 = vshra.s32 %v2111_v29, 6  ;;  %v1087_v57 = vshra.s32 %v2154_v51, 6  ;;  %v1048_v51 = vld [vmem:[%s2454_s7 + $0x20] sm:$0xff] }
 0x3b4   :  { %924 = vmatmul.f32.vlgmr.msra.gmra.mxu3 %v644_v41  ;;  %v1094_v41 = vshra.s32 %v2012_v26, 6  ;;  %v1089_v26 = vshra.s32 %v2081_v12, 6  ;;  %v1084_v12 = vshra.s32 %v2262_v50, 6  ;;  %v1082_v50 = vshra.s32 %v2287_v22, 6 }
 0x3b5   :  { %vm1109_vm1 = vcmp.eq.s32.totalorder %v1093_v25, %v1506_v52  ;;  %vm1108_vm2 = vcmp.eq.s32.totalorder %v1092_v44, %v1506_v52  ;;  %v1080_v22 = vshra.s32 %v2314_v8, 6  ;;  %v1054_v8 = vld [vmem:[%s2455_s8] sm:$0xff] }
 0x3b6   :  { %vm1110_vm8 = vcmp.eq.s32.totalorder %v1094_v41, %v1506_v52 }
 0x3b7   :  { %1240 = vmatpush.msk.msrb.mxu2 %vm1110_vm8, %v1377_v15 }
 0x3b9   :  { %1241 = vmatpush.msk.msrb.mxu2 %vm1109_vm1, %v1377_v15 }
 0x3bb   :  { %1242 = vmatpush.msk.msrb.mxu2 %vm1108_vm2, %v1377_v15 }
 0x42e   :  { %v905_v34 = vpop.f32.mrf.mxu2 }
 0x430   :  { %v865_v48 = vpop.f32.mrf.mxu0  ;;  %v885_v24 = vpop.f32.mrf.mxu1 }
 0x431   :  { %v886_v33 = vadd.f32 %v885_v24, %v865_v48  ;;  %v1091_v48 = vshra.s32 %v2040_v60, 6  ;;  %v1090_v24 = vshra.s32 %v2052_v9, 6  ;;  %v1086_v60 = vshra.s32 %v2192_v59, 6 }
 0x432   :  { %v1085_v9 = vshra.s32 %v2249_v13, 6  ;;  %v1083_v59 = vshra.s32 %v2270_v31, 6  ;;  %v1047_v13 = vld [vmem:[%s2454_s7 + $0x18] sm:$0xff]  ;;  %v1081_v31 = vshra.s32 %v2299_v18, 6  ;;  %v1044_v18 = vld [vmem:[%s2454_s7] sm:$0xff] }
 0x433   :  { %v906_v49 = vadd.f32 %v905_v34, %v886_v33 }
 0x437   :  { %v925_v53 = vpop.f32.mrf.mxu3 }
 0x438   :  { %v926_v45 = vadd.f32 %v925_v53, %v906_v49  ;;  %v1046_v49 = vld [vmem:[%s2454_s7 + $0x10] sm:$0xff] }
 0x43a   :  { %962 = vrot.lane.b32.xlu2 %v926_v45, %s1378_s2  ;;  %968 = vrot.lane.b32.xlu1 %v926_v45, %s1379_s3 }
 0x43b   :  { %973 = vrot.lane.b32.xlu0 %v926_v45, %s1380_s29 }
 0x442   :  { %957 = vrot.lane.b32.xlu2 %v926_v45, %s1372_s20  ;;  %941 = vrot.lane.b32.xlu1 %v926_v45, %s1381_s30 }
 0x443   :  { %952 = vrot.lane.b32.xlu0 %v926_v45, %s1371_s19 }
 0x44a   :  { %946 = vrot.lane.b32.xlu2 %v926_v45, %s1382_s11 }
 0x44b   :  { %935 = vrot.lane.b32.xlu0 %v926_v45, %s1383_s12 }
 0x494   :  { %v963_v5 = vpop.permute.xlu2 %962 }
 0x49c   :  { %v958_v32 = vpop.permute.xlu2 %957 }
 0x4a4   :  { %v947_v62 = vpop.permute.xlu2 %946 }
 0x4ac   :  { %v969_v27 = vpop.permute.xlu1 %968 }
 0x4ad   :  { %v974_v56 = vpop.permute.xlu0 %973 }
 0x4ae   :  { %1230 = vmatpush.msk.msra.mxu0 %vm975_vm14, %v974_v56  ;;  %vm1105_vm14 = vcmp.eq.s32.totalorder %v1089_v26, %v1506_v52 }
 0x4b0   :  { %1231 = vmatpush.msk.msra.mxu0 %vm932_vm12, %v969_v27  ;;  %vm1107_vm12 = vcmp.eq.s32.totalorder %v1091_v48, %v1506_v52  ;;  %v1079_v27 = vshra.s32 %v1996_v63, 6 }
 0x4b1   :  { %1243 = vmatpush.msk.msrb.mxu2 %vm1107_vm12, %v1377_v15 }
 0x4b2   :  { %1232 = vmatpush.msk.msra.mxu0 %vm964_vm3, %v963_v5  ;;  %vm1103_vm3 = vcmp.eq.s32.totalorder %v1087_v57, %v1506_v52  ;;  %vm1095_vm8 = vcmp.eq.s32.totalorder %v1079_v27, %v1506_v52 }
 0x4b4   :  { %1233 = vmatpush.msk.msra.mxu0 %vm934_vm0, %v958_v32  ;;  %v942_v42 = vpop.permute.xlu1 %941  ;;  %vm1106_vm0 = vcmp.eq.s32.totalorder %v1090_v24, %v1506_v52 }
 0x4b5   :  { %v953_v54 = vpop.permute.xlu0 %952  ;;  %1244 = vmatpush.msk.msrb.mxu2 %vm1106_vm0, %v1377_v15 }
 0x4b6   :  { %994 = vmatpush.msra.mxu0 %v926_v45  ;;  %v1045_v45 = vld [vmem:[%s2454_s7 + $0x8] sm:$0xff] }
 0x4b7   :  { %1245 = vmatpush.msk.msrb.mxu2 %vm1105_vm14, %v1377_v15 }
 0x4b8   :  { %1234 = vmatpush.msk.msra.mxu0 %vm933_vm9, %v953_v54  ;;  %vm1104_vm9 = vcmp.eq.s32.totalorder %v1088_v47, %v1506_v52 }
 0x4b9   :  { %1246 = vmatpush.msk.msrb.mxu2 %vm1104_vm9, %v1377_v15 }
 0x4ba   :  { %1235 = vmatpush.msk.msra.mxu0 %vm948_vm7, %v947_v62  ;;  %vm1101_vm7 = vcmp.eq.s32.totalorder %v1085_v9, %v1506_v52 }
 0x4bb   :  { %1247 = vmatpush.msk.msrb.mxu2 %vm1103_vm3, %v1377_v15 }
 0x4bc   :  { %1236 = vmatpush.msk.msra.mxu0 %vm931_vm13, %v942_v42  ;;  %vm1102_vm13 = vcmp.eq.s32.totalorder %v1086_v60, %v1506_v52 }
 0x4bd   :  { %v936_v58 = vpop.permute.xlu0 %935  ;;  %1248 = vmatpush.msk.msrb.mxu2 %vm1102_vm13, %v1377_v15 }
 0x4be   :  { %1237 = vmatpush.msk.msra.mxu0 %vm937_vm6, %v936_v58  ;;  %vm1100_vm6 = vcmp.eq.s32.totalorder %v1084_v12, %v1506_v52 }
 0x4bf   :  { %1238 = vmatmul.msk.f32.vlgmr.msra.gmra.mxu0 %vm979_vm4, %v928_v20  ;;  %1249 = vmatpush.msk.msrb.mxu2 %vm1101_vm7, %v1377_v15  ;;  %vm1099_vm4 = vcmp.eq.s32.totalorder %v1083_v59, %v1506_v52 }
 0x4c1   :  { %1250 = vmatpush.msk.msrb.mxu2 %vm1100_vm6, %v1377_v15 }
 0x4c3   :  { %1251 = vmatpush.msk.msrb.mxu2 %vm1099_vm4, %v1377_v15 }
 0x53c   :  { %v1000_v46 = vpop.f32.mrf.mxu0 }
 0x53d   :  { %1003 = vadd.xlane.f32.xlu2 %v1000_v46 }
 0x555   :  { %1130 = vperm.xlu2 %1342, %v1127_v30  }
 0x5b0   :  { %v1004_v37 = vpop.xlane.xlu2 %1003 }
 0x5b1   :  { %v1005_v38 = vmul.f32 0.0078125, %v1004_v37 }
 0x5b3   :  { %v1006_v11 = vsub.f32 %v1000_v46, %v1005_v38 }
 0x5b5   :  { %v1007_v43 = vmul.f32 %v1006_v11, %v1006_v11 }
 0x5b7   :  { %1008 = vadd.xlane.f32.xlu1 %v1007_v43 }
 0x5b8   :  { %v1131_v62 = vpop.permute.xlu2 %1130 }
 0x62a   :  { %v1009_v23 = vpop.xlane.xlu1 %1008 }
 0x62b   :  { %v1010_v1 = vmul.f32 0.0078125, %v1009_v23 }
 0x62d   :  { %v1011_v55 = vadd.f32 1e-05, %v1010_v1 }
 0x62f   :  { %1366 = vrsqrt.f32 %v1011_v55  ;;  %vm1018_vm11 = vweird.f32 %v1011_v55 }
 0x635   :  { %v1367_v3 = vpop.eup %1366 }
 0x636   :  { %v1013_v4 = vmul.f32 %v1367_v3, %v1011_v55  ;;  %vm1019_vm5 = vweird.f32 %v1367_v3 }
 0x637   :  { %vm1020_vm15 = vmor %vm1018_vm11, %vm1019_vm5  ;;  %vm1098_vm5 = vcmp.eq.s32.totalorder %v1082_v50, %v1506_v52  ;;  %vm1097_vm11 = vcmp.eq.s32.totalorder %v1081_v31, %v1506_v52 }
 0x638   :  { %v1014_v10 = vmul.f32 %v1367_v3, %v1013_v4  ;;  %1252 = vmatpush.msk.msrb.mxu2 %vm1098_vm5, %v1377_v15 }
 0x63a   :  { %v1015_v14 = vmul.f32 0.5, %v1014_v10  ;;  %1253 = vmatpush.msk.msrb.mxu2 %vm1097_vm11, %v1377_v15 }
 0x63c   :  { %v1016_v39 = vsub.f32 1.5, %v1015_v14 }
 0x63e   :  { %v1017_v36 = vmul.f32 %v1367_v3, %v1016_v39 }
 0x640   :  { %v1021_v19 = vsel %vm1020_vm15, %v1367_v3, %v1017_v36  ;;  %vm1096_vm15 = vcmp.eq.s32.totalorder %v1080_v22, %v1506_v52 }
 0x641   :  { %v1022_v0 = vmul.f32 %v1021_v19, %v929_v2  ;;  %1254 = vmatpush.msk.msrb.mxu2 %vm1096_vm15, %v1377_v15 }
 0x643   :  { %1025 = vperm.xlu0 %1363, %v1022_v0   ;;  %1255 = vmatpush.msk.msrb.mxu2 %vm1095_vm8, %v1377_v15 }
 0x64b   :  { %1031 = vperm.xlu0 %1363, %v930_v16  }
 0x6b5   :  { %v1026_v28 = vpop.permute.xlu0 %1025 }
 0x6b6   :  { %v1028_v7 = vmul.f32 %v1026_v28, %v1006_v11 }
 0x6bd   :  { %v1032_v17 = vpop.permute.xlu0 %1031 }
 0x6be   :  { %v1034_v21 = vadd.f32 %v1032_v17, %v1028_v7 }
 0x6c0   :  { %v1036_v40 = vmul.f32 0.01, %v1034_v21  ;;  %vm1035_vm10 = vcmp.gt.f32.partialorder %v1034_v21, 0.0 }
 0x6c2   :  { %v1037_v61 = vsel %vm1035_vm10, %v1034_v21, %v1036_v40  ;;  %vm1055_vm10 = vcmask 326656  }
 0x6c3   :  { %1038 = vrot.lane.b32.xlu0 %v1037_v61, %s1372_s20 }
 0x735   :  { %v1039_v6 = vpop.permute.xlu0 %1038 }
 0x736   :  { %v1040_v35 = vmax.f32 %v1037_v61, %v1039_v6 }
 0x738   :  { %1041 = vrot.lane.b32.xlu0 %v1040_v35, %s1379_s3 }
 0x7aa   :  { %v1042_v29 = vpop.permute.xlu0 %1041 }
 0x7ab   :  { %v1043_v33 = vmax.f32 %v1040_v35, %v1042_v29 }
 0x7ad   :  { %v1053_v34 = vmul.f32 %v1048_v51, %v1043_v33  ;;  %v1052_v53 = vmul.f32 %v1047_v13, %v1043_v33  ;;  %v1051_v5 = vmul.f32 %v1046_v49, %v1043_v33  ;;  %v1050_v56 = vmul.f32 %v1045_v45, %v1043_v33 }
 0x7ae   :  { %v1049_v32 = vmul.f32 %v1044_v18, %v1043_v33 }
 0x7af   :  { %1070 = vmatpush.msra.mxu1 %v1053_v34 }
 0x7b1   :  { %1071 = vmatpush.msra.mxu1 %v1052_v53 }
 0x7b3   :  { %1072 = vmatpush.msra.mxu1 %v1051_v5 }
 0x7b5   :  { %1073 = vmatpush.msra.mxu1 %v1050_v56 }
 0x7b7   :  { %1074 = vmatpush.msra.mxu1 %v1049_v32 }
 0x7b8   :  { %1239 = vmatmul.msk.f32.vlgmr.msra.gmra.mxu1 %vm1055_vm10, %v1054_v8 }
 0x835   :  { %v1076_v54 = vpop.f32.mrf.mxu1 }
 0x836   :  { %1149 = vmatmul.f32.vlgmr.msrb.gmra.mxu2 %v1076_v54 }
 0x8b9   :  { %v1150_v42 = vpop.f32.mrf.mxu2 }
 0x8ba   :  { %v1151_v20 = vadd.f32 %v1150_v42, %v1131_v62 }
 0x8bc   :  { %1153 = vst [vmem:[%s2456_s10] sm:$0xff] %v1151_v20 }

</bundles_post_ra>
